<compile_context>
chip_gen: v7x
topology: tpu7x:2x2x1
jax: 0.10.0
libtpu: 0.0.40
codegen_flags: <defaults>
</compile_context>

<pallas_src>
import jax
import jax.numpy as jnp
from jax.experimental import pallas as pl
from jax.experimental.pallas import tpu as pltpu

IN_F = 180
H1, H2, H3 = 256, 128, 32
OUT_F = 7
OUT_PAD = 128  # lane-dense padded logits width; true logits are columns [:7]


def mlp_kernel(x_ref, w1_ref, b1_ref, w2_ref, b2_ref, w3_ref, b3_ref,
               w4_ref, b4_ref, o_ref):
    # fc1 + ReLU  (bf16 operands on the MXU, f32 accumulation, f32 elementwise)
    h = jnp.dot(x_ref[...], w1_ref[...], preferred_element_type=jnp.float32)
    h = jnp.maximum(h + b1_ref[...], 0.0)
    # fc2 + ReLU
    h = jnp.dot(h.astype(jnp.bfloat16), w2_ref[...],
                preferred_element_type=jnp.float32)
    h = jnp.maximum(h + b2_ref[...], 0.0)
    # fc3 + ReLU
    h = jnp.dot(h.astype(jnp.bfloat16), w3_ref[...],
                preferred_element_type=jnp.float32)
    h = jnp.maximum(h + b3_ref[...], 0.0)
    # output layer (no activation); 128-wide zero-padded so the store is lane-dense
    h = jnp.dot(h.astype(jnp.bfloat16), w4_ref[...],
                preferred_element_type=jnp.float32)
    o_ref[...] = (h + b4_ref[...]).astype(o_ref.dtype)


def mlp_forward(x, params, *, block_b=256):
    """x: [B, 180] float32. params: (in,out) f32 weights, (1,out) f32 biases.

    Returns [B, 7] float32 logits (same math as the torch module, with bf16
    matmul operands and f32 accumulation).
    """
    B, F = x.shape
    assert F == IN_F, f"expected {IN_F} flattened features, got {F}"

    # Round the batch up to a multiple of the tile; padded rows are sliced off below.
    n_blocks = max(1, -(-B // block_b))
    B_pad = n_blocks * block_b
    if B_pad != B:
        x = jnp.pad(x, ((0, B_pad - B), (0, 0)))

    # bf16 weights + bf16 x tile (f32 accumulation inside the kernel), f32 biases.
    w1 = params["w1"].astype(jnp.bfloat16)
    w2 = params["w2"].astype(jnp.bfloat16)
    w3 = params["w3"].astype(jnp.bfloat16)
    w4 = jnp.pad(params["w4"], ((0, 0), (0, OUT_PAD - OUT_F))).astype(jnp.bfloat16)
    b1, b2, b3 = params["b1"], params["b2"], params["b3"]
    b4 = jnp.pad(params["b4"], ((0, 0), (0, OUT_PAD - OUT_F)))
    x_bf = x.astype(jnp.bfloat16)

    # Weights/biases: full-array blocks with constant index_map => fetched once,
    # reused across all batch grid steps.
    def rep(arr):
        return pl.BlockSpec(arr.shape, lambda i: (0, 0))

    grid = (B_pad // block_b,)
    out = pl.pallas_call(
        mlp_kernel,
        out_shape=jax.ShapeDtypeStruct((B_pad, OUT_PAD), jnp.float32),
        grid_spec=pltpu.PrefetchScalarGridSpec(
            num_scalar_prefetch=0,
            grid=grid,
            in_specs=[
                pl.BlockSpec((block_b, IN_F), lambda i: (i, 0)),  # x tile
                rep(w1), rep(b1),
                rep(w2), rep(b2),
                rep(w3), rep(b3),
                rep(w4), rep(b4),
            ],
            out_specs=pl.BlockSpec((block_b, OUT_PAD), lambda i: (i, 0)),
        ),
        compiler_params=pltpu.CompilerParams(
            dimension_semantics=("parallel",),
            # Per-tile working set is < 2 MiB at block_b=256, well under every
            # generation's VMEM (64 MiB v7x, 128 MiB v5e/v6e); defaults are ample.
        ),
    )(x_bf, w1, b1, w2, b2, w3, b3, w4, b4)

    return out[:B, :OUT_F]


def init_params(key):
    """Deterministic synthetic init matching nn.Linear shapes (stored transposed
    as [in, out] so y = x @ W + b matches torch's x @ W.T + b)."""
    dims = [(IN_F, H1), (H1, H2), (H2, H3), (H3, OUT_F)]
    params = {}
    for idx, (fin, fout) in enumerate(dims, start=1):
        key, kw, kb = jax.random.split(key, 3)
        bound = 1.0 / jnp.sqrt(fin)  # torch default uniform bound
        params[f"w{idx}"] = jax.random.uniform(
            kw, (fin, fout), jnp.float32, -bound, bound)
        params[f"b{idx}"] = jax.random.uniform(
            kb, (1, fout), jnp.float32, -bound, bound)
    return params


def reference_forward(x, params):
    """Pure-JAX reference mirroring the kernel's bf16-operand / f32-accumulate math."""
    bf, f32 = jnp.bfloat16, jnp.float32
    h = jnp.dot(x.astype(bf), params["w1"].astype(bf), preferred_element_type=f32)
    h = jnp.maximum(h + params["b1"], 0.0)
    h = jnp.dot(h.astype(bf), params["w2"].astype(bf), preferred_element_type=f32)
    h = jnp.maximum(h + params["b2"], 0.0)
    h = jnp.dot(h.astype(bf), params["w3"].astype(bf), preferred_element_type=f32)
    h = jnp.maximum(h + params["b3"], 0.0)
    h = jnp.dot(h.astype(bf), params["w4"].astype(bf), preferred_element_type=f32)
    return h + params["b4"]


if __name__ == "__main__":
    key = jax.random.PRNGKey(0)
    kx, kp = jax.random.split(key)

    # The module does x.view(x.size(0), -1) expecting 180 flattened features.
    # Small example batch; wrapper pads it up to one 256-row MXU tile (1 grid step).
    B = 16
    x = jax.random.normal(kx, (B, IN_F), jnp.float32)
    params = init_params(kp)

    out = mlp_forward(x, params, block_b=256)
    out = jax.block_until_ready(out)

    ref = reference_forward(x, params)
    assert out.shape == (B, OUT_F)
    assert jnp.allclose(out, ref, atol=2e-3, rtol=2e-3), "mismatch vs JAX reference"

    print("KERNEL_OK")
</pallas_src>

<mosaic_0001>
module attributes {stable_mosaic.version = 11 : i64} {
  func.func @mlp_kernel(%arg0: i32, %arg1: memref<256x180xbf16, #tpu.memory_space<vmem>>, %arg2: memref<180x256xbf16, #tpu.memory_space<vmem>>, %arg3: memref<1x256xf32, #tpu.memory_space<vmem>>, %arg4: memref<256x128xbf16, #tpu.memory_space<vmem>>, %arg5: memref<1x128xf32, #tpu.memory_space<vmem>>, %arg6: memref<128x32xbf16, #tpu.memory_space<vmem>>, %arg7: memref<1x32xf32, #tpu.memory_space<vmem>>, %arg8: memref<32x128xbf16, #tpu.memory_space<vmem>>, %arg9: memref<1x128xf32, #tpu.memory_space<vmem>>, %arg10: memref<256x128xf32, #tpu.memory_space<vmem>>) attributes {dimension_semantics = [#tpu.dimension_semantics<parallel>], iteration_bounds = array<i64: 1>, scalar_prefetch = 0 : i64, scratch_operands = 0 : i64, tpu.core_type = #tpu.core_type<tc>, window_params = [{transform_indices = @transform_0, window_bounds = array<i64: 256, 180>}, {pipeline_mode = #tpu.pipeline_mode<synchronous>, transform_indices = @transform_1, window_bounds = array<i64: 180, 256>}, {pipeline_mode = #tpu.pipeline_mode<synchronous>, transform_indices = @transform_2, window_bounds = array<i64: 1, 256>}, {pipeline_mode = #tpu.pipeline_mode<synchronous>, transform_indices = @transform_3, window_bounds = array<i64: 256, 128>}, {pipeline_mode = #tpu.pipeline_mode<synchronous>, transform_indices = @transform_4, window_bounds = array<i64: 1, 128>}, {pipeline_mode = #tpu.pipeline_mode<synchronous>, transform_indices = @transform_5, window_bounds = array<i64: 128, 32>}, {pipeline_mode = #tpu.pipeline_mode<synchronous>, transform_indices = @transform_6, window_bounds = array<i64: 1, 32>}, {pipeline_mode = #tpu.pipeline_mode<synchronous>, transform_indices = @transform_7, window_bounds = array<i64: 32, 128>}, {pipeline_mode = #tpu.pipeline_mode<synchronous>, transform_indices = @transform_8, window_bounds = array<i64: 1, 128>}, {transform_indices = @transform_9, window_bounds = array<i64: 256, 128>}]} {
    %c0 = arith.constant 0 : index
    %c0_0 = arith.constant 0 : index
    %0 = vector.load %arg1[%c0, %c0_0] : memref<256x180xbf16, #tpu.memory_space<vmem>>, vector<256x180xbf16>
    %c0_1 = arith.constant 0 : index
    %c0_2 = arith.constant 0 : index
    %1 = vector.load %arg2[%c0_1, %c0_2] : memref<180x256xbf16, #tpu.memory_space<vmem>>, vector<180x256xbf16>
    %cst = arith.constant dense<0.000000e+00> : vector<256x256xf32>
    %2 = tpu.matmul %0, %1, %cst {dimension_numbers = #tpu.dot_dimension_numbers<[1], [0], [0], [1], [0, 0, 1, 1], [], []>} : vector<256x180xbf16>, vector<180x256xbf16>, vector<256x256xf32> -> vector<256x256xf32>
    %c0_3 = arith.constant 0 : index
    %c0_4 = arith.constant 0 : index
    %3 = vector.load %arg3[%c0_3, %c0_4] : memref<1x256xf32, #tpu.memory_space<vmem>>, vector<1x256xf32>
    %4 = vector.broadcast %3 : vector<1x256xf32> to vector<256x256xf32>
    %5 = arith.addf %2, %4 : vector<256x256xf32>
    %cst_5 = arith.constant 0.000000e+00 : f32
    %6 = vector.broadcast %cst_5 : f32 to vector<256x256xf32>
    %7 = arith.maximumf %5, %6 : vector<256x256xf32>
    %8 = arith.truncf %7 : vector<256x256xf32> to vector<256x256xbf16>
    %c0_6 = arith.constant 0 : index
    %c0_7 = arith.constant 0 : index
    %9 = vector.load %arg4[%c0_6, %c0_7] : memref<256x128xbf16, #tpu.memory_space<vmem>>, vector<256x128xbf16>
    %cst_8 = arith.constant dense<0.000000e+00> : vector<256x128xf32>
    %10 = tpu.matmul %8, %9, %cst_8 {dimension_numbers = #tpu.dot_dimension_numbers<[1], [0], [0], [1], [0, 0, 1, 1], [], []>} : vector<256x256xbf16>, vector<256x128xbf16>, vector<256x128xf32> -> vector<256x128xf32>
    %c0_9 = arith.constant 0 : index
    %c0_10 = arith.constant 0 : index
    %11 = vector.load %arg5[%c0_9, %c0_10] : memref<1x128xf32, #tpu.memory_space<vmem>>, vector<1x128xf32>
    %12 = vector.broadcast %11 : vector<1x128xf32> to vector<256x128xf32>
    %13 = arith.addf %10, %12 : vector<256x128xf32>
    %cst_11 = arith.constant 0.000000e+00 : f32
    %14 = vector.broadcast %cst_11 : f32 to vector<256x128xf32>
    %15 = arith.maximumf %13, %14 : vector<256x128xf32>
    %16 = arith.truncf %15 : vector<256x128xf32> to vector<256x128xbf16>
    %c0_12 = arith.constant 0 : index
    %c0_13 = arith.constant 0 : index
    %17 = vector.load %arg6[%c0_12, %c0_13] : memref<128x32xbf16, #tpu.memory_space<vmem>>, vector<128x32xbf16>
    %cst_14 = arith.constant dense<0.000000e+00> : vector<256x32xf32>
    %18 = tpu.matmul %16, %17, %cst_14 {dimension_numbers = #tpu.dot_dimension_numbers<[1], [0], [0], [1], [0, 0, 1, 1], [], []>} : vector<256x128xbf16>, vector<128x32xbf16>, vector<256x32xf32> -> vector<256x32xf32>
    %c0_15 = arith.constant 0 : index
    %c0_16 = arith.constant 0 : index
    %19 = vector.load %arg7[%c0_15, %c0_16] : memref<1x32xf32, #tpu.memory_space<vmem>>, vector<1x32xf32>
    %20 = vector.broadcast %19 : vector<1x32xf32> to vector<256x32xf32>
    %21 = arith.addf %18, %20 : vector<256x32xf32>
    %cst_17 = arith.constant 0.000000e+00 : f32
    %22 = vector.broadcast %cst_17 : f32 to vector<256x32xf32>
    %23 = arith.maximumf %21, %22 : vector<256x32xf32>
    %24 = arith.truncf %23 : vector<256x32xf32> to vector<256x32xbf16>
    %c0_18 = arith.constant 0 : index
    %c0_19 = arith.constant 0 : index
    %25 = vector.load %arg8[%c0_18, %c0_19] : memref<32x128xbf16, #tpu.memory_space<vmem>>, vector<32x128xbf16>
    %cst_20 = arith.constant dense<0.000000e+00> : vector<256x128xf32>
    %26 = tpu.matmul %24, %25, %cst_20 {dimension_numbers = #tpu.dot_dimension_numbers<[1], [0], [0], [1], [0, 0, 1, 1], [], []>} : vector<256x32xbf16>, vector<32x128xbf16>, vector<256x128xf32> -> vector<256x128xf32>
    %c0_21 = arith.constant 0 : index
    %c0_22 = arith.constant 0 : index
    %27 = vector.load %arg9[%c0_21, %c0_22] : memref<1x128xf32, #tpu.memory_space<vmem>>, vector<1x128xf32>
    %28 = vector.broadcast %27 : vector<1x128xf32> to vector<256x128xf32>
    %29 = arith.addf %26, %28 : vector<256x128xf32>
    %c0_23 = arith.constant 0 : index
    %c0_24 = arith.constant 0 : index
    %30 = vector.load %arg10[%c0_23, %c0_24] : memref<256x128xf32, #tpu.memory_space<vmem>>, vector<256x128xf32>
    tpu.vector_store %arg10[%c0_23, %c0_24], %29 {strides = array<i32>} : memref<256x128xf32, #tpu.memory_space<vmem>>, vector<256x128xf32>,
    return
  }
  func.func @transform_0(%arg0: i32) -> (i32, i32) {
    %c0_i32 = arith.constant 0 : i32
    %c0_i32_0 = arith.constant 0 : i32
    return %arg0, %c0_i32 : i32, i32
  }
  func.func @transform_1(%arg0: i32) -> (i32, i32) {
    %c0_i32 = arith.constant 0 : i32
    %c0_i32_0 = arith.constant 0 : i32
    %c0_i32_1 = arith.constant 0 : i32
    return %c0_i32, %c0_i32_0 : i32, i32
  }
  func.func @transform_2(%arg0: i32) -> (i32, i32) {
    %c0_i32 = arith.constant 0 : i32
    %c0_i32_0 = arith.constant 0 : i32
    %c0_i32_1 = arith.constant 0 : i32
    return %c0_i32, %c0_i32_0 : i32, i32
  }
  func.func @transform_3(%arg0: i32) -> (i32, i32) {
    %c0_i32 = arith.constant 0 : i32
    %c0_i32_0 = arith.constant 0 : i32
    %c0_i32_1 = arith.constant 0 : i32
    return %c0_i32, %c0_i32_0 : i32, i32
  }
  func.func @transform_4(%arg0: i32) -> (i32, i32) {
    %c0_i32 = arith.constant 0 : i32
    %c0_i32_0 = arith.constant 0 : i32
    %c0_i32_1 = arith.constant 0 : i32
    return %c0_i32, %c0_i32_0 : i32, i32
  }
  func.func @transform_5(%arg0: i32) -> (i32, i32) {
    %c0_i32 = arith.constant 0 : i32
    %c0_i32_0 = arith.constant 0 : i32
    %c0_i32_1 = arith.constant 0 : i32
    return %c0_i32, %c0_i32_0 : i32, i32
  }
  func.func @transform_6(%arg0: i32) -> (i32, i32) {
    %c0_i32 = arith.constant 0 : i32
    %c0_i32_0 = arith.constant 0 : i32
    %c0_i32_1 = arith.constant 0 : i32
    return %c0_i32, %c0_i32_0 : i32, i32
  }
  func.func @transform_7(%arg0: i32) -> (i32, i32) {
    %c0_i32 = arith.constant 0 : i32
    %c0_i32_0 = arith.constant 0 : i32
    %c0_i32_1 = arith.constant 0 : i32
    return %c0_i32, %c0_i32_0 : i32, i32
  }
  func.func @transform_8(%arg0: i32) -> (i32, i32) {
    %c0_i32 = arith.constant 0 : i32
    %c0_i32_0 = arith.constant 0 : i32
    %c0_i32_1 = arith.constant 0 : i32
    return %c0_i32, %c0_i32_0 : i32, i32
  }
  func.func @transform_9(%arg0: i32) -> (i32, i32) {
    %c0_i32 = arith.constant 0 : i32
    %c0_i32_0 = arith.constant 0 : i32
    return %arg0, %c0_i32 : i32, i32
  }
}

</mosaic_0001>

<bundles_post_ra>
// kernel: tpu_custom_call.1
= control target key start
LH: loop header
LB: loop body
LE: loop exit
PB: predicated region body
PF: predicated region fallthrough
CT: control target
= control target key end

     0   :  { %vm360_vm0 = vcmask 424960   ;;  %vm409_vm1 = vcmask 1041408   ;;  %s2628_s0 = inlined_call_operand.vmem [shape: bf16[256,180], index: 0, kind: input, shape index: {}]   ;;  %s2629_s1 = inlined_call_operand.vmem [shape: bf16[180,256], index: 1, kind: input, shape index: {}]   ;;  %s2630_s2 = inlined_call_operand.vmem [shape: f32[1,256], index: 2, kind: input, shape index: {}]   ;;  %s2631_s3 = inlined_call_operand.vmem [shape: bf16[256,128], index: 3, kind: input, shape index: {}]   ;;  %s2632_s4 = inlined_call_operand.vmem [shape: f32[1,128], index: 4, kind: input, shape index: {}]   ;;  %s2633_s5 = inlined_call_operand.vmem [shape: bf16[128,32], index: 5, kind: input, shape index: {}]   ;;  %s2634_s6 = inlined_call_operand.vmem [shape: f32[1,32], index: 6, kind: input, shape index: {}]   ;;  %s2635_s7 = inlined_call_operand.vmem [shape: bf16[32,128], index: 7, kind: input, shape index: {}]   ;;  %s2636_s8 = inlined_call_operand.vmem [shape: f32[1,128], index: 8, kind: input, shape index: {}]   ;;  %s2637_s9 = inlined_call_operand.hbm [shape: f32[256,128], index: 9, kind: output, shape index: {}]  }
   0x1   :  { %v1973_v0 = vld [vmem:[%s2629_s1 + $0x4] ss:$8 sps:$4 sm:$0xff]   ;;  %v1975_v1 = vld [vmem:[%s2629_s1] ss:$8 sps:$4 sm:$0xff]   ;;  %v1976_v2 = vld [vmem:[%s2629_s1 + $0x14] ss:$8 sps:$4 sm:$0xff]  }
   0x2   :  { %416 = vmatprep.subr.bf16.mxu0 %v1973_v0  ;;  %v1978_v3 = vld [vmem:[%s2629_s1 + $0x10] ss:$8 sps:$4 sm:$0xff]   ;;  %v1979_v4 = vld [vmem:[%s2629_s1 + $0x24] ss:$8 sps:$4 sm:$0xff]   ;;  %v1981_v5 = vld [vmem:[%s2629_s1 + $0x20] ss:$8 sps:$4 sm:$0xff]  }
   0x3   :  { %417 = vmatpush1.bf16.msra.mxu0 %v1975_v1  ;;  %v1982_v6 = vld [vmem:[%s2629_s1 + $0x34] ss:$8 sps:$4 sm:$0xff]   ;;  %v1984_v7 = vld [vmem:[%s2629_s1 + $0x30] ss:$8 sps:$4 sm:$0xff]   ;;  %v1985_v8 = vld [vmem:[%s2629_s1 + $0x44] ss:$8 sps:$4 sm:$0xff]  }
   0x4   :  { %418 = vmatprep.subr.bf16.mxu0 %v1976_v2  ;;  %v1987_v9 = vld [vmem:[%s2629_s1 + $0x40] ss:$8 sps:$4 sm:$0xff]   ;;  %v1988_v10 = vld [vmem:[%s2629_s1 + $0x54] ss:$8 sps:$4 sm:$0xff]   ;;  %v2010_v11 = vld [vmem:[%s2628_s0 + $0x4] ss:$8 sps:$4 sm:$0xff]  }
   0x5   :  { %1667 = vmatprep.mubr.msk.bf16.mxu0 %vm360_vm0, %v2010_v11  ;;  %v1990_v12 = vld [vmem:[%s2629_s1 + $0x50] ss:$8 sps:$4 sm:$0xff]   ;;  %v1991_v13 = vld [vmem:[%s2629_s1 + $0x64] ss:$8 sps:$4 sm:$0xff]   ;;  %v1993_v14 = vld [vmem:[%s2629_s1 + $0x60] ss:$8 sps:$4 sm:$0xff]  }
   0x6   :  { %v1994_v15 = vld [vmem:[%s2629_s1 + $0x74] ss:$8 sps:$4 sm:$0xff]   ;;  %v1996_v16 = vld [vmem:[%s2629_s1 + $0x70] ss:$8 sps:$4 sm:$0xff]   ;;  %v1997_v17 = vld [vmem:[%s2629_s1 + $0x84] ss:$8 sps:$4 sm:$0xff]  }
   0x7   :  { %419 = vmatpush1.bf16.msra.mxu0 %v1978_v3  ;;  %v1999_v18 = vld [vmem:[%s2629_s1 + $0x80] ss:$8 sps:$4 sm:$0xff]   ;;  %v2000_v19 = vld [vmem:[%s2629_s1 + $0x94] ss:$8 sps:$4 sm:$0xff]   ;;  %v2002_v20 = vld [vmem:[%s2629_s1 + $0x90] ss:$8 sps:$4 sm:$0xff]  }
   0x8   :  { %420 = vmatprep.subr.bf16.mxu0 %v1979_v4  ;;  %v2003_v21 = vld [vmem:[%s2629_s1 + $0xa4] ss:$8 sps:$4 sm:$0xff]   ;;  %v88_v22 = vld [vmem:[%s2629_s1 + $0xb0] sm:$0x33]  ;;  %v2005_v23 = vld [vmem:[%s2629_s1 + $0xa0] ss:$8 sps:$4 sm:$0xff]  }
   0x9   :  { %v1665_v24 = vcombine.high %v88_v22, %v88_v22  ;;  %v1664_v25 = vcombine.low %v88_v22, %v88_v22  ;;  %v2056_v26 = vld [vmem:[%s2631_s3 + $0x40] sm:$0xff]   ;;  %v2058_v28 = vld [vmem:[%s2631_s3 + $0x48] sm:$0xff]   ;;  %v2060_v32 = vld [vmem:[%s2631_s3 + $0x50] sm:$0xff]  }
   0xa   :  { %v2057_v27 = vld [vmem:[%s2631_s3] sm:$0xff]   ;;  %1728 = vmatprep.subr.bf16.mxu1 %v2056_v26  ;;  %v2059_v31 = vld [vmem:[%s2631_s3 + $0x8] sm:$0xff]   ;;  %v2011_v33 = vld [vmem:[%s2628_s0 + $0x14] ss:$8 sps:$4 sm:$0xff]  }
   0xb   :  { %421 = vmatpush1.bf16.msra.mxu0 %v1981_v5  ;;  %v411_v29 = vsel %vm409_vm1, %v1664_v25, 0  ;;  %v2008_v30 = vld [vmem:[%s2628_s0] ss:$8 sps:$4 sm:$0xff]   ;;  %1729 = vmatpush3.bf16.msra.mxu1 %v2057_v27  ;;  %v2061_v34 = vld [vmem:[%s2631_s3 + $0x10] sm:$0xff]   ;;  %v2062_v35 = vld [vmem:[%s2631_s3 + $0x58] sm:$0xff]  }
   0xc   :  { %422 = vmatprep.subr.bf16.mxu0 %v1982_v6  ;;  %1730 = vmatprep.subr.bf16.mxu1 %v2058_v28  ;;  %v2063_v36 = vld [vmem:[%s2631_s3 + $0x18] sm:$0xff]   ;;  %v2064_v38 = vld [vmem:[%s2631_s3 + $0x60] sm:$0xff]  }
   0xd   :  { %v2013_v37 = vld [vmem:[%s2628_s0 + $0x10] ss:$8 sps:$4 sm:$0xff]   ;;  %v2014_v39 = vld [vmem:[%s2628_s0 + $0x24] ss:$8 sps:$4 sm:$0xff]  }
   0xe   :  { %v2065_v40 = vld [vmem:[%s2631_s3 + $0x20] sm:$0xff]  }
   0xf   :  { %423 = vmatpush1.bf16.msra.mxu0 %v1984_v7  ;;  %1731 = vmatpush3.bf16.msra.mxu1 %v2059_v31 }
  0x10   :  { %424 = vmatprep.subr.bf16.mxu0 %v1985_v8  ;;  %1732 = vmatprep.subr.bf16.mxu1 %v2060_v32 }
  0x13   :  { %425 = vmatpush1.bf16.msra.mxu0 %v1987_v9  ;;  %1733 = vmatpush3.bf16.msra.mxu1 %v2061_v34 }
  0x14   :  { %426 = vmatprep.subr.bf16.mxu0 %v1988_v10  ;;  %1734 = vmatprep.subr.bf16.mxu1 %v2062_v35 }
  0x17   :  { %427 = vmatpush1.bf16.msra.mxu0 %v1990_v12  ;;  %1735 = vmatpush3.bf16.msra.mxu1 %v2063_v36 }
  0x18   :  { %428 = vmatprep.subr.bf16.mxu0 %v1991_v13 }
  0x1b   :  { %429 = vmatpush1.bf16.msra.mxu0 %v1993_v14 }
  0x1c   :  { %430 = vmatprep.subr.bf16.mxu0 %v1994_v15 }
  0x1f   :  { %431 = vmatpush1.bf16.msra.mxu0 %v1996_v16 }
  0x20   :  { %432 = vmatprep.subr.bf16.mxu0 %v1997_v17 }
  0x23   :  { %433 = vmatpush1.bf16.msra.mxu0 %v1999_v18 }
  0x24   :  { %434 = vmatprep.subr.bf16.mxu0 %v2000_v19 }
  0x27   :  { %435 = vmatpush1.bf16.msra.mxu0 %v2002_v20 }
  0x28   :  { %436 = vmatprep.subr.bf16.mxu0 %v2003_v21 }
  0x2b   :  { %437 = vmatpush1.bf16.msra.mxu0 %v2005_v23 }
  0x2c   :  { %1666 = vmatprep.subr.msk.bf16.mxu0 %vm409_vm1, %v1665_v24 }
  0x2f   :  { %439 = vmatpush1.bf16.msra.mxu0 %v411_v29 }
  0x32   :  { %449 = vmatmul.mubr.bf16.vlgmr.msra.gmra.mrb[0].mxu0 %v2008_v30 }
  0x33   :  { %1668 = vmatprep.mubr.msk.bf16.mxu0 %vm360_vm0, %v2011_v33 }
  0x34   :  { %14 = vsyncpa [#allocation3], 0  ;;  %1736 = vmatprep.subr.bf16.mxu1 %v2064_v38  ;;  %v2066_v41 = vld [vmem:[%s2631_s3 + $0x68] sm:$0xff]   ;;  %v2017_v43 = vld [vmem:[%s2628_s0 + $0x34] ss:$8 sps:$4 sm:$0xff]   ;;  %v91_v10 = vlaneseq  ;;  %vm1352_vm2 = vcmask 261120  }
  0x35   :  { %1737 = vmatpush3.bf16.msra.mxu1 %v2065_v40  ;;  %v2016_v42 = vld [vmem:[%s2628_s0 + $0x20] ss:$8 sps:$4 sm:$0xff]   ;;  %v2019_v44 = vld [vmem:[%s2628_s0 + $0x30] ss:$8 sps:$4 sm:$0xff]   ;;  %v2020_v45 = vld [vmem:[%s2628_s0 + $0x44] ss:$8 sps:$4 sm:$0xff]  }
  0x36   :  { %1738 = vmatprep.subr.bf16.mxu1 %v2066_v41  ;;  %v2022_v46 = vld [vmem:[%s2628_s0 + $0x40] ss:$8 sps:$4 sm:$0xff]   ;;  %v2023_v47 = vld [vmem:[%s2628_s0 + $0x54] ss:$8 sps:$4 sm:$0xff]   ;;  %v2025_v48 = vld [vmem:[%s2628_s0 + $0x50] ss:$8 sps:$4 sm:$0xff]  }
  0x37   :  { %v2026_v49 = vld [vmem:[%s2628_s0 + $0x64] ss:$8 sps:$4 sm:$0xff]   ;;  %v2028_v50 = vld [vmem:[%s2628_s0 + $0x60] ss:$8 sps:$4 sm:$0xff]   ;;  %v2029_v51 = vld [vmem:[%s2628_s0 + $0x74] ss:$8 sps:$4 sm:$0xff]  }
  0x38   :  { %v2031_v52 = vld [vmem:[%s2628_s0 + $0x70] ss:$8 sps:$4 sm:$0xff]   ;;  %v2032_v53 = vld [vmem:[%s2628_s0 + $0x84] ss:$8 sps:$4 sm:$0xff]   ;;  %v2034_v54 = vld [vmem:[%s2628_s0 + $0x80] ss:$8 sps:$4 sm:$0xff]  }
  0x39   :  { %v2035_v55 = vld [vmem:[%s2628_s0 + $0x94] ss:$8 sps:$4 sm:$0xff]   ;;  %v2037_v56 = vld [vmem:[%s2628_s0 + $0x90] ss:$8 sps:$4 sm:$0xff]   ;;  %v2038_v57 = vld [vmem:[%s2628_s0 + $0xa4] ss:$8 sps:$4 sm:$0xff]  }
  0x3a   :  { %459 = vmatmul.mubr.bf16.gmra.mrb[4].mxu0 %v2013_v37  ;;  %v2040_v58 = vld [vmem:[%s2628_s0 + $0xa0] ss:$8 sps:$4 sm:$0xff]   ;;  %v2041_v59 = vld [vmem:[%s2628_s0 + $0xb4] ss:$8 sps:$4 sm:$0xff]   ;;  %v2043_v61 = vld [vmem:[%s2628_s0 + $0xb0] ss:$8 sps:$4 sm:$0xff]  }
  0x3b   :  { %1669 = vmatprep.mubr.msk.bf16.mxu0 %vm360_vm0, %v2014_v39  ;;  %v2067_v60 = vld [vmem:[%s2631_s3 + $0x28] sm:$0xff]   ;;  %v2068_v62 = vld [vmem:[%s2631_s3 + $0x70] sm:$0xff]   ;;  %v2070_v1 = vld [vmem:[%s2631_s3 + $0x78] sm:$0xff]   ;;  %v92_v11 = vshrl.u32 %v91_v10, 7 }
  0x3c   :  { %1739 = vmatpush3.bf16.msra.mxu1 %v2067_v60  ;;  %v2044_v63 = vld [vmem:[%s2628_s0 + $0xc4] ss:$8 sps:$4 sm:$0xff]   ;;  %v2069_v0 = vld [vmem:[%s2631_s3 + $0x30] sm:$0xff]   ;;  %v2071_v2 = vld [vmem:[%s2631_s3 + $0x38] sm:$0xff]  }
  0x3d   :  { %1740 = vmatprep.subr.bf16.mxu1 %v2068_v62  ;;  %v2046_v3 = vld [vmem:[%s2628_s0 + $0xc0] ss:$8 sps:$4 sm:$0xff]   ;;  %v2047_v4 = vld [vmem:[%s2628_s0 + $0xd4] ss:$8 sps:$4 sm:$0xff]   ;;  %v2049_v5 = vld [vmem:[%s2628_s0 + $0xd0] ss:$8 sps:$4 sm:$0xff]  }
  0x3e   :  { %v2050_v6 = vld [vmem:[%s2628_s0 + $0xe4] ss:$8 sps:$4 sm:$0xff]   ;;  %v2052_v7 = vld [vmem:[%s2628_s0 + $0xe0] ss:$8 sps:$4 sm:$0xff]   ;;  %v2053_v8 = vld [vmem:[%s2628_s0 + $0xf4] ss:$8 sps:$4 sm:$0xff]  }
  0x3f   :  { %v2055_v9 = vld [vmem:[%s2628_s0 + $0xf0] ss:$8 sps:$4 sm:$0xff]   ;;  %v93_v12 = vsub.s32 0, %v92_v11  ;;  %v89_v13 = vld [vmem:[%s2630_s2] sm:$0x3]  ;;  %v97_v14 = vsub.s32 1, %v92_v11 }
  0x40   :  { %1741 = vmatpush3.bf16.msra.mxu1 %v2069_v0  ;;  %v2072_v24 = vld [vmem:[%s2633_s5] sm:$0xff]   ;;  %v2073_v35 = vld [vmem:[%s2633_s5 + $0x8] sm:$0xff]  }
  0x41   :  { %1742 = vmatprep.subr.bf16.mxu1 %v2070_v1  ;;  %v2391_v15 = vrot.slane %v89_v13, %v93_v12  ;;  %v2393_v16 = vrot.slane %v89_v13, %v97_v14 }
  0x42   :  { %469 = vmatmul.mubr.bf16.gmra.mrb[8].mxu0 %v2016_v42 }
  0x43   :  { %1670 = vmatprep.mubr.msk.bf16.mxu0 %vm360_vm0, %v2017_v43  ;;  %v2074_v43 = vld [vmem:[%s2633_s5 + $0x10] sm:$0xff]  }
  0x44   :  { %1743 = vmatpush3.bf16.msra.mxu1 %v2071_v2 }
  0x45   :  { %1882 = vmatprep.subr.bf16.mxu1 %v2072_v24 }
  0x4a   :  { %479 = vmatmul.mubr.bf16.gmra.mrb[12].mxu0 %v2019_v44 }
  0x4b   :  { %1671 = vmatprep.mubr.msk.bf16.mxu0 %vm360_vm0, %v2020_v45 }
  0x52   :  { %489 = vmatmul.mubr.bf16.gmra.mrb[16].mxu0 %v2022_v46 }
  0x53   :  { %1672 = vmatprep.mubr.msk.bf16.mxu0 %vm360_vm0, %v2023_v47 }
  0x5a   :  { %499 = vmatmul.mubr.bf16.gmra.mrb[20].mxu0 %v2025_v48 }
  0x5b   :  { %1673 = vmatprep.mubr.msk.bf16.mxu0 %vm360_vm0, %v2026_v49 }
  0x62   :  { %509 = vmatmul.mubr.bf16.gmra.mrb[24].mxu0 %v2028_v50 }
  0x63   :  { %1674 = vmatprep.mubr.msk.bf16.mxu0 %vm360_vm0, %v2029_v51  ;;  %v2075_v51 = vld [vmem:[%s2633_s5 + $0x18] sm:$0xff]  }
  0x6a   :  { %519 = vmatmul.mubr.bf16.gmra.mrb[28].mxu0 %v2031_v52 }
  0x6b   :  { %1675 = vmatprep.mubr.msk.bf16.mxu0 %vm360_vm0, %v2032_v53 }
  0x72   :  { %529 = vmatmul.mubr.bf16.gmra.mrb[32].mxu0 %v2034_v54 }
  0x73   :  { %1676 = vmatprep.mubr.msk.bf16.mxu0 %vm360_vm0, %v2035_v55 }
  0x7a   :  { %539 = vmatmul.mubr.bf16.gmra.mrb[36].mxu0 %v2037_v56 }
  0x7b   :  { %1677 = vmatprep.mubr.msk.bf16.mxu0 %vm360_vm0, %v2038_v57 }
  0x82   :  { %549 = vmatmul.mubr.bf16.gmra.mrb[40].mxu0 %v2040_v58 }
  0x83   :  { %1678 = vmatprep.mubr.msk.bf16.mxu0 %vm360_vm0, %v2041_v59 }
  0x8a   :  { %559 = vmatmul.mubr.bf16.gmra.mrb[44].mxu0 %v2043_v61 }
  0x8b   :  { %1679 = vmatprep.mubr.msk.bf16.mxu0 %vm360_vm0, %v2044_v63 }
  0x92   :  { %569 = vmatmul.mubr.bf16.gmra.mrb[48].mxu0 %v2046_v3 }
  0x93   :  { %1680 = vmatprep.mubr.msk.bf16.mxu0 %vm360_vm0, %v2047_v4 }
  0x9a   :  { %579 = vmatmul.mubr.bf16.gmra.mrb[52].mxu0 %v2049_v5 }
  0x9b   :  { %1681 = vmatprep.mubr.msk.bf16.mxu0 %vm360_vm0, %v2050_v6 }
  0xa2   :  { %589 = vmatmul.mubr.bf16.gmra.mrb[56].mxu0 %v2052_v7 }
  0xa3   :  { %1682 = vmatprep.mubr.msk.bf16.mxu0 %vm360_vm0, %v2053_v8 }
  0xaa   :  { %599 = vmatmul.mubr.bf16.gmra.mrb[60].mxu0 %v2055_v9 }
 0x105   :  { %v450_v17 = vpop.f32.mrb[0].mxu0 }
 0x106   :  { %v451_v18 = vadd.f32 %v450_v17, %v2391_v15  ;;  %v452_v19 = vpop.f32.mrb[1].mxu0 }
 0x107   :  { %v453_v20 = vadd.f32 %v452_v19, %v2393_v16  ;;  %v454_v21 = vpop.f32.mrb[2].mxu0 }
 0x108   :  { %v455_v22 = vadd.f32 %v454_v21, %v2391_v15  ;;  %v456_v23 = vpop.f32.mrb[3].mxu0  ;;  %v609_v26 = vmax.f32 %v451_v18, 0.0 }
 0x109   :  { %v457_v25 = vadd.f32 %v456_v23, %v2393_v16  ;;  %v610_v28 = vmax.f32 %v453_v20, 0.0 }
 0x10a   :  { %v611_v27 = vmax.f32 %v455_v22, 0.0 }
 0x10b   :  { %v612_v29 = vmax.f32 %v457_v25, 0.0 }
 0x10c   :  { %v673_v30 = vpack.c.bf16 %v611_v27, %v609_v26 }
 0x10d   :  { %v460_v31 = vpop.f32.mrb[4].mxu0  ;;  %v674_v32 = vpack.c.bf16 %v612_v29, %v610_v28 }
 0x10e   :  { %v461_v33 = vadd.f32 %v460_v31, %v2391_v15  ;;  %v462_v34 = vpop.f32.mrb[5].mxu0 }
 0x10f   :  { %v463_v36 = vadd.f32 %v462_v34, %v2393_v16  ;;  %v464_v37 = vpop.f32.mrb[6].mxu0  ;;  %872 = vmatprep.mubr.bf16.mxu1 %v674_v32 }
 0x110   :  { %v465_v38 = vadd.f32 %v464_v37, %v2391_v15  ;;  %v466_v39 = vpop.f32.mrb[7].mxu0  ;;  %873 = vmatmul.mubr.bf16.vlgmr.msra.gmra.mrb[0].mxu1 %v673_v30  ;;  %v613_v41 = vmax.f32 %v461_v33, 0.0 }
 0x111   :  { %v467_v40 = vadd.f32 %v466_v39, %v2393_v16  ;;  %1883 = vmatpush3.bf16.msra.mxu1 %v2072_v24  ;;  %v614_v44 = vmax.f32 %v463_v36, 0.0 }
 0x112   :  { %v615_v42 = vmax.f32 %v465_v38, 0.0  ;;  %1884 = vmatprep.subr.bf16.mxu1 %v2073_v35 }
 0x113   :  { %v616_v45 = vmax.f32 %v467_v40, 0.0 }
 0x114   :  { %v675_v46 = vpack.c.bf16 %v615_v42, %v613_v41 }
 0x115   :  { %v676_v47 = vpack.c.bf16 %v616_v45, %v614_v44  ;;  %v470_v48 = vpop.f32.mrb[8].mxu0  ;;  %1885 = vmatpush3.bf16.msra.mxu1 %v2073_v35 }
 0x116   :  { %v471_v49 = vadd.f32 %v470_v48, %v2391_v15  ;;  %v472_v50 = vpop.f32.mrb[9].mxu0  ;;  %1886 = vmatprep.subr.bf16.mxu1 %v2074_v43 }
 0x117   :  { %v473_v52 = vadd.f32 %v472_v50, %v2393_v16  ;;  %v474_v53 = vpop.f32.mrb[10].mxu0  ;;  %880 = vmatprep.mubr.bf16.mxu1 %v676_v47 }
 0x118   :  { %v475_v54 = vadd.f32 %v474_v53, %v2391_v15  ;;  %v476_v55 = vpop.f32.mrb[11].mxu0  ;;  %881 = vmatmul.mubr.bf16.gmra.mrb[4].mxu1 %v675_v46  ;;  %v617_v57 = vmax.f32 %v471_v49, 0.0 }
 0x119   :  { %v477_v56 = vadd.f32 %v476_v55, %v2393_v16  ;;  %1887 = vmatpush3.bf16.msra.mxu1 %v2074_v43  ;;  %v618_v59 = vmax.f32 %v473_v52, 0.0 }
 0x11a   :  { %v619_v58 = vmax.f32 %v475_v54, 0.0  ;;  %1888 = vmatprep.subr.bf16.mxu1 %v2075_v51 }
 0x11b   :  { %v620_v60 = vmax.f32 %v477_v56, 0.0 }
 0x11c   :  { %v677_v61 = vpack.c.bf16 %v619_v58, %v617_v57 }
 0x11d   :  { %v678_v62 = vpack.c.bf16 %v620_v60, %v618_v59  ;;  %v480_v63 = vpop.f32.mrb[12].mxu0  ;;  %1889 = vmatpush3.bf16.msra.mxu1 %v2075_v51 }
 0x11e   :  { %v481_v0 = vadd.f32 %v480_v63, %v2391_v15  ;;  %v482_v1 = vpop.f32.mrb[13].mxu0 }
 0x11f   :  { %v483_v2 = vadd.f32 %v482_v1, %v2393_v16  ;;  %v484_v3 = vpop.f32.mrb[14].mxu0  ;;  %888 = vmatprep.mubr.bf16.mxu1 %v678_v62 }
 0x120   :  { %v485_v4 = vadd.f32 %v484_v3, %v2391_v15  ;;  %v486_v5 = vpop.f32.mrb[15].mxu0  ;;  %889 = vmatmul.mubr.bf16.gmra.mrb[8].mxu1 %v677_v61  ;;  %v621_v7 = vmax.f32 %v481_v0, 0.0 }
 0x121   :  { %v487_v6 = vadd.f32 %v486_v5, %v2393_v16  ;;  %v622_v9 = vmax.f32 %v483_v2, 0.0 }
 0x122   :  { %v623_v8 = vmax.f32 %v485_v4, 0.0 }
 0x123   :  { %v624_v10 = vmax.f32 %v487_v6, 0.0 }
 0x124   :  { %v679_v11 = vpack.c.bf16 %v623_v8, %v621_v7 }
 0x125   :  { %v680_v12 = vpack.c.bf16 %v624_v10, %v622_v9  ;;  %v490_v13 = vpop.f32.mrb[16].mxu0 }
 0x126   :  { %v491_v14 = vadd.f32 %v490_v13, %v2391_v15  ;;  %v492_v17 = vpop.f32.mrb[17].mxu0 }
 0x127   :  { %v493_v18 = vadd.f32 %v492_v17, %v2393_v16  ;;  %v494_v19 = vpop.f32.mrb[18].mxu0  ;;  %896 = vmatprep.mubr.bf16.mxu1 %v680_v12 }
 0x128   :  { %v495_v20 = vadd.f32 %v494_v19, %v2391_v15  ;;  %v496_v21 = vpop.f32.mrb[19].mxu0  ;;  %897 = vmatmul.mubr.bf16.gmra.mrb[12].mxu1 %v679_v11  ;;  %v625_v23 = vmax.f32 %v491_v14, 0.0 }
 0x129   :  { %v497_v22 = vadd.f32 %v496_v21, %v2393_v16  ;;  %v626_v25 = vmax.f32 %v493_v18, 0.0 }
 0x12a   :  { %v627_v24 = vmax.f32 %v495_v20, 0.0 }
 0x12b   :  { %v628_v26 = vmax.f32 %v497_v22, 0.0 }
 0x12c   :  { %v681_v27 = vpack.c.bf16 %v627_v24, %v625_v23 }
 0x12d   :  { %v682_v28 = vpack.c.bf16 %v628_v26, %v626_v25  ;;  %v500_v29 = vpop.f32.mrb[20].mxu0 }
 0x12e   :  { %v501_v30 = vadd.f32 %v500_v29, %v2391_v15  ;;  %v502_v31 = vpop.f32.mrb[21].mxu0 }
 0x12f   :  { %v503_v32 = vadd.f32 %v502_v31, %v2393_v16  ;;  %v504_v33 = vpop.f32.mrb[22].mxu0  ;;  %904 = vmatprep.mubr.bf16.mxu1 %v682_v28 }
 0x130   :  { %v505_v34 = vadd.f32 %v504_v33, %v2391_v15  ;;  %v506_v35 = vpop.f32.mrb[23].mxu0  ;;  %905 = vmatmul.mubr.bf16.gmra.mrb[16].mxu1 %v681_v27  ;;  %v629_v37 = vmax.f32 %v501_v30, 0.0 }
 0x131   :  { %v507_v36 = vadd.f32 %v506_v35, %v2393_v16  ;;  %v630_v39 = vmax.f32 %v503_v32, 0.0 }
 0x132   :  { %v631_v38 = vmax.f32 %v505_v34, 0.0 }
 0x133   :  { %v632_v40 = vmax.f32 %v507_v36, 0.0 }
 0x134   :  { %v683_v41 = vpack.c.bf16 %v631_v38, %v629_v37 }
 0x135   :  { %v684_v42 = vpack.c.bf16 %v632_v40, %v630_v39  ;;  %v510_v43 = vpop.f32.mrb[24].mxu0 }
 0x136   :  { %v511_v44 = vadd.f32 %v510_v43, %v2391_v15  ;;  %v512_v45 = vpop.f32.mrb[25].mxu0 }
 0x137   :  { %v513_v46 = vadd.f32 %v512_v45, %v2393_v16  ;;  %v514_v47 = vpop.f32.mrb[26].mxu0  ;;  %912 = vmatprep.mubr.bf16.mxu1 %v684_v42 }
 0x138   :  { %v515_v48 = vadd.f32 %v514_v47, %v2391_v15  ;;  %v516_v49 = vpop.f32.mrb[27].mxu0  ;;  %913 = vmatmul.mubr.bf16.gmra.mrb[20].mxu1 %v683_v41  ;;  %v633_v51 = vmax.f32 %v511_v44, 0.0 }
 0x139   :  { %v517_v50 = vadd.f32 %v516_v49, %v2393_v16  ;;  %v634_v53 = vmax.f32 %v513_v46, 0.0 }
 0x13a   :  { %v635_v52 = vmax.f32 %v515_v48, 0.0 }
 0x13b   :  { %v636_v54 = vmax.f32 %v517_v50, 0.0 }
 0x13c   :  { %v685_v55 = vpack.c.bf16 %v635_v52, %v633_v51 }
 0x13d   :  { %v686_v56 = vpack.c.bf16 %v636_v54, %v634_v53  ;;  %v520_v57 = vpop.f32.mrb[28].mxu0 }
 0x13e   :  { %v521_v58 = vadd.f32 %v520_v57, %v2391_v15  ;;  %v522_v59 = vpop.f32.mrb[29].mxu0 }
 0x13f   :  { %v523_v60 = vadd.f32 %v522_v59, %v2393_v16  ;;  %v524_v61 = vpop.f32.mrb[30].mxu0  ;;  %920 = vmatprep.mubr.bf16.mxu1 %v686_v56 }
 0x140   :  { %v525_v62 = vadd.f32 %v524_v61, %v2391_v15  ;;  %v526_v63 = vpop.f32.mrb[31].mxu0  ;;  %921 = vmatmul.mubr.bf16.gmra.mrb[24].mxu1 %v685_v55  ;;  %v637_v1 = vmax.f32 %v521_v58, 0.0 }
 0x141   :  { %v527_v0 = vadd.f32 %v526_v63, %v2393_v16  ;;  %v638_v3 = vmax.f32 %v523_v60, 0.0 }
 0x142   :  { %v639_v2 = vmax.f32 %v525_v62, 0.0 }
 0x143   :  { %v640_v4 = vmax.f32 %v527_v0, 0.0 }
 0x144   :  { %v687_v5 = vpack.c.bf16 %v639_v2, %v637_v1  ;;  %v2076_v2 = vld [vmem:[%s2633_s5 + $0x20] sm:$0xff]  }
 0x145   :  { %v688_v6 = vpack.c.bf16 %v640_v4, %v638_v3  ;;  %v530_v7 = vpop.f32.mrb[32].mxu0  ;;  %1890 = vmatprep.subr.bf16.mxu1 %v2076_v2 }
 0x146   :  { %v531_v8 = vadd.f32 %v530_v7, %v2391_v15  ;;  %v532_v9 = vpop.f32.mrb[33].mxu0  ;;  %1891 = vmatpush3.bf16.msra.mxu1 %v2076_v2 }
 0x147   :  { %v533_v10 = vadd.f32 %v532_v9, %v2393_v16  ;;  %v534_v11 = vpop.f32.mrb[34].mxu0  ;;  %928 = vmatprep.mubr.bf16.mxu1 %v688_v6 }
 0x148   :  { %v535_v12 = vadd.f32 %v534_v11, %v2391_v15  ;;  %v536_v13 = vpop.f32.mrb[35].mxu0  ;;  %929 = vmatmul.mubr.bf16.gmra.mrb[28].mxu1 %v687_v5  ;;  %v641_v17 = vmax.f32 %v531_v8, 0.0 }
 0x149   :  { %v537_v14 = vadd.f32 %v536_v13, %v2393_v16  ;;  %v642_v19 = vmax.f32 %v533_v10, 0.0  ;;  %v2077_v10 = vld [vmem:[%s2633_s5 + $0x28] sm:$0xff]  }
 0x14a   :  { %v643_v18 = vmax.f32 %v535_v12, 0.0  ;;  %1892 = vmatprep.subr.bf16.mxu1 %v2077_v10 }
 0x14b   :  { %v644_v20 = vmax.f32 %v537_v14, 0.0  ;;  %1893 = vmatpush3.bf16.msra.mxu1 %v2077_v10 }
 0x14c   :  { %v689_v21 = vpack.c.bf16 %v643_v18, %v641_v17 }
 0x14d   :  { %v690_v22 = vpack.c.bf16 %v644_v20, %v642_v19  ;;  %v540_v23 = vpop.f32.mrb[36].mxu0  ;;  %v2078_v20 = vld [vmem:[%s2633_s5 + $0x30] sm:$0xff]  }
 0x14e   :  { %v541_v24 = vadd.f32 %v540_v23, %v2391_v15  ;;  %v542_v25 = vpop.f32.mrb[37].mxu0  ;;  %1894 = vmatprep.subr.bf16.mxu1 %v2078_v20 }
 0x14f   :  { %v543_v26 = vadd.f32 %v542_v25, %v2393_v16  ;;  %v544_v27 = vpop.f32.mrb[38].mxu0  ;;  %936 = vmatprep.mubr.bf16.mxu1 %v690_v22  ;;  %1895 = vmatpush3.bf16.msra.mxu1 %v2078_v20 }
 0x150   :  { %v545_v28 = vadd.f32 %v544_v27, %v2391_v15  ;;  %v546_v29 = vpop.f32.mrb[39].mxu0  ;;  %937 = vmatmul.mubr.bf16.gmra.mrb[32].mxu1 %v689_v21  ;;  %v645_v31 = vmax.f32 %v541_v24, 0.0 }
 0x151   :  { %v547_v30 = vadd.f32 %v546_v29, %v2393_v16  ;;  %v646_v33 = vmax.f32 %v543_v26, 0.0 }
 0x152   :  { %v647_v32 = vmax.f32 %v545_v28, 0.0  ;;  %v2079_v28 = vld [vmem:[%s2633_s5 + $0x38] sm:$0xff]  }
 0x153   :  { %v648_v34 = vmax.f32 %v547_v30, 0.0  ;;  %1896 = vmatprep.subr.bf16.mxu1 %v2079_v28 }
 0x154   :  { %v691_v35 = vpack.c.bf16 %v647_v32, %v645_v31  ;;  %1897 = vmatpush3.bf16.msra.mxu1 %v2079_v28 }
 0x155   :  { %v692_v36 = vpack.c.bf16 %v648_v34, %v646_v33  ;;  %v550_v37 = vpop.f32.mrb[40].mxu0 }
 0x156   :  { %v551_v38 = vadd.f32 %v550_v37, %v2391_v15  ;;  %v552_v39 = vpop.f32.mrb[41].mxu0 }
 0x157   :  { %v553_v40 = vadd.f32 %v552_v39, %v2393_v16  ;;  %v554_v41 = vpop.f32.mrb[42].mxu0  ;;  %944 = vmatprep.mubr.bf16.mxu1 %v692_v36 }
 0x158   :  { %v555_v42 = vadd.f32 %v554_v41, %v2391_v15  ;;  %v556_v43 = vpop.f32.mrb[43].mxu0  ;;  %945 = vmatmul.mubr.bf16.gmra.mrb[36].mxu1 %v691_v35  ;;  %v649_v45 = vmax.f32 %v551_v38, 0.0 }
 0x159   :  { %v557_v44 = vadd.f32 %v556_v43, %v2393_v16  ;;  %v650_v47 = vmax.f32 %v553_v40, 0.0 }
 0x15a   :  { %v651_v46 = vmax.f32 %v555_v42, 0.0 }
 0x15b   :  { %v652_v48 = vmax.f32 %v557_v44, 0.0 }
 0x15c   :  { %v693_v49 = vpack.c.bf16 %v651_v46, %v649_v45 }
 0x15d   :  { %v694_v50 = vpack.c.bf16 %v652_v48, %v650_v47  ;;  %v560_v51 = vpop.f32.mrb[44].mxu0 }
 0x15e   :  { %v561_v52 = vadd.f32 %v560_v51, %v2391_v15  ;;  %v562_v53 = vpop.f32.mrb[45].mxu0 }
 0x15f   :  { %v563_v54 = vadd.f32 %v562_v53, %v2393_v16  ;;  %v564_v55 = vpop.f32.mrb[46].mxu0  ;;  %952 = vmatprep.mubr.bf16.mxu1 %v694_v50 }
 0x160   :  { %v565_v56 = vadd.f32 %v564_v55, %v2391_v15  ;;  %v566_v57 = vpop.f32.mrb[47].mxu0  ;;  %953 = vmatmul.mubr.bf16.gmra.mrb[40].mxu1 %v693_v49  ;;  %v653_v59 = vmax.f32 %v561_v52, 0.0 }
 0x161   :  { %v567_v58 = vadd.f32 %v566_v57, %v2393_v16  ;;  %v654_v61 = vmax.f32 %v563_v54, 0.0 }
 0x162   :  { %v655_v60 = vmax.f32 %v565_v56, 0.0 }
 0x163   :  { %v656_v62 = vmax.f32 %v567_v58, 0.0 }
 0x164   :  { %v695_v63 = vpack.c.bf16 %v655_v60, %v653_v59 }
 0x165   :  { %v696_v0 = vpack.c.bf16 %v656_v62, %v654_v61  ;;  %v570_v1 = vpop.f32.mrb[48].mxu0 }
 0x166   :  { %v571_v3 = vadd.f32 %v570_v1, %v2391_v15  ;;  %v572_v4 = vpop.f32.mrb[49].mxu0 }
 0x167   :  { %v573_v5 = vadd.f32 %v572_v4, %v2393_v16  ;;  %v574_v6 = vpop.f32.mrb[50].mxu0  ;;  %960 = vmatprep.mubr.bf16.mxu1 %v696_v0  ;;  %v2486_v0 = vld [vmem:[%s2632_s4] ss:$0 sm:$0xff] }
 0x168   :  { %v575_v7 = vadd.f32 %v574_v6, %v2391_v15  ;;  %v576_v8 = vpop.f32.mrb[51].mxu0  ;;  %961 = vmatmul.mubr.bf16.gmra.mrb[44].mxu1 %v695_v63  ;;  %v657_v11 = vmax.f32 %v571_v3, 0.0 }
 0x169   :  { %v577_v9 = vadd.f32 %v576_v8, %v2393_v16  ;;  %v658_v13 = vmax.f32 %v573_v5, 0.0  ;;  %v2080_v5 = vld [vmem:[%s2635_s7] sm:$0xff]  }
 0x16a   :  { %v659_v12 = vmax.f32 %v575_v7, 0.0  ;;  %1930 = vmatprep.subr.bf16.mxu0 %v2080_v5  ;;  %1966 = vmatprep.subr.bf16.mxu1 %v2080_v5 }
 0x16b   :  { %v660_v14 = vmax.f32 %v577_v9, 0.0  ;;  %1931 = vmatpush3.bf16.msra.mxu0 %v2080_v5 }
 0x16c   :  { %v697_v17 = vpack.c.bf16 %v659_v12, %v657_v11 }
 0x16d   :  { %v698_v18 = vpack.c.bf16 %v660_v14, %v658_v13  ;;  %v580_v19 = vpop.f32.mrb[52].mxu0 }
 0x16e   :  { %v581_v21 = vadd.f32 %v580_v19, %v2391_v15  ;;  %v582_v22 = vpop.f32.mrb[53].mxu0 }
 0x16f   :  { %v583_v23 = vadd.f32 %v582_v22, %v2393_v16  ;;  %v584_v24 = vpop.f32.mrb[54].mxu0  ;;  %968 = vmatprep.mubr.bf16.mxu1 %v698_v18 }
 0x170   :  { %v585_v25 = vadd.f32 %v584_v24, %v2391_v15  ;;  %v586_v26 = vpop.f32.mrb[55].mxu0  ;;  %969 = vmatmul.mubr.bf16.gmra.mrb[48].mxu1 %v697_v17  ;;  %v661_v29 = vmax.f32 %v581_v21, 0.0 }
 0x171   :  { %v587_v27 = vadd.f32 %v586_v26, %v2393_v16  ;;  %v662_v31 = vmax.f32 %v583_v23, 0.0 }
 0x172   :  { %v663_v30 = vmax.f32 %v585_v25, 0.0 }
 0x173   :  { %v664_v32 = vmax.f32 %v587_v27, 0.0 }
 0x174   :  { %v699_v33 = vpack.c.bf16 %v663_v30, %v661_v29 }
 0x175   :  { %v700_v34 = vpack.c.bf16 %v664_v32, %v662_v31  ;;  %v590_v35 = vpop.f32.mrb[56].mxu0 }
 0x176   :  { %v591_v36 = vadd.f32 %v590_v35, %v2391_v15  ;;  %v592_v37 = vpop.f32.mrb[57].mxu0 }
 0x177   :  { %v593_v38 = vadd.f32 %v592_v37, %v2393_v16  ;;  %v594_v39 = vpop.f32.mrb[58].mxu0  ;;  %976 = vmatprep.mubr.bf16.mxu1 %v700_v34 }
 0x178   :  { %v595_v40 = vadd.f32 %v594_v39, %v2391_v15  ;;  %v596_v41 = vpop.f32.mrb[59].mxu0  ;;  %977 = vmatmul.mubr.bf16.gmra.mrb[52].mxu1 %v699_v33  ;;  %v665_v43 = vmax.f32 %v591_v36, 0.0 }
 0x179   :  { %v597_v42 = vadd.f32 %v596_v41, %v2393_v16  ;;  %v666_v45 = vmax.f32 %v593_v38, 0.0 }
 0x17a   :  { %v667_v44 = vmax.f32 %v595_v40, 0.0 }
 0x17b   :  { %v668_v46 = vmax.f32 %v597_v42, 0.0 }
 0x17c   :  { %v701_v47 = vpack.c.bf16 %v667_v44, %v665_v43 }
 0x17d   :  { %v702_v48 = vpack.c.bf16 %v668_v46, %v666_v45  ;;  %v600_v49 = vpop.f32.mrb[60].mxu0 }
 0x17e   :  { %v601_v50 = vadd.f32 %v600_v49, %v2391_v15  ;;  %v602_v51 = vpop.f32.mrb[61].mxu0 }
 0x17f   :  { %v603_v52 = vadd.f32 %v602_v51, %v2393_v16  ;;  %v604_v53 = vpop.f32.mrb[62].mxu0  ;;  %984 = vmatprep.mubr.bf16.mxu1 %v702_v48 }
 0x180   :  { %v605_v54 = vadd.f32 %v604_v53, %v2391_v15  ;;  %v606_v55 = vpop.f32.mrb[63].mxu0  ;;  %985 = vmatmul.mubr.bf16.gmra.mrb[56].mxu1 %v701_v47  ;;  %v669_v57 = vmax.f32 %v601_v50, 0.0 }
 0x181   :  { %v607_v56 = vadd.f32 %v606_v55, %v2393_v16  ;;  %v670_v59 = vmax.f32 %v603_v52, 0.0 }
 0x182   :  { %v671_v58 = vmax.f32 %v605_v54, 0.0 }
 0x183   :  { %v672_v60 = vmax.f32 %v607_v56, 0.0 }
 0x184   :  { %v703_v61 = vpack.c.bf16 %v671_v58, %v669_v57 }
 0x185   :  { %v704_v62 = vpack.c.bf16 %v672_v60, %v670_v59 }
 0x187   :  { %992 = vmatprep.mubr.bf16.mxu1 %v704_v62 }
 0x188   :  { %993 = vmatmul.mubr.bf16.gmra.mrb[60].mxu1 %v703_v61 }
 0x1e3   :  { %v1744_v63 = vpop.f32.mrb[0].mxu1 }
 0x1e4   :  { %v1745_v1 = vpop.f32.mrb[1].mxu1 }
 0x1e5   :  { %v1746_v15 = vadd.f32 %v1745_v1, %v1744_v63  ;;  %v1747_v2 = vpop.f32.mrb[2].mxu1 }
 0x1e6   :  { %v1748_v3 = vpop.f32.mrb[3].mxu1 }
 0x1e7   :  { %v875_v16 = vadd.f32 %v1746_v15, %v2486_v0  ;;  %v1749_v4 = vadd.f32 %v1748_v3, %v1747_v2 }
 0x1e9   :  { %v878_v6 = vadd.f32 %v1749_v4, %v2486_v0  ;;  %v1001_v7 = vmax.f32 %v875_v16, 0.0 }
 0x1eb   :  { %v1002_v8 = vmax.f32 %v878_v6, 0.0  ;;  %v1750_v9 = vpop.f32.mrb[4].mxu1 }
 0x1ec   :  { %v1751_v10 = vpop.f32.mrb[5].mxu1 }
 0x1ed   :  { %v1752_v11 = vadd.f32 %v1751_v10, %v1750_v9  ;;  %v1753_v12 = vpop.f32.mrb[6].mxu1  ;;  %v1033_v13 = vpack.c.bf16 %v1002_v8, %v1001_v7 }
 0x1ee   :  { %v1754_v14 = vpop.f32.mrb[7].mxu1 }
 0x1ef   :  { %v883_v17 = vadd.f32 %v1752_v11, %v2486_v0  ;;  %v1755_v18 = vadd.f32 %v1754_v14, %v1753_v12  ;;  %1898 = vmatprep.mubr.bf16.mxu1 %v1033_v13 }
 0x1f1   :  { %v886_v19 = vadd.f32 %v1755_v18, %v2486_v0  ;;  %v1003_v20 = vmax.f32 %v883_v17, 0.0 }
 0x1f3   :  { %v1004_v21 = vmax.f32 %v886_v19, 0.0  ;;  %v1756_v22 = vpop.f32.mrb[8].mxu1 }
 0x1f4   :  { %v1757_v23 = vpop.f32.mrb[9].mxu1 }
 0x1f5   :  { %v1034_v24 = vpack.c.bf16 %v1004_v21, %v1003_v20  ;;  %v1758_v25 = vadd.f32 %v1757_v23, %v1756_v22  ;;  %v1759_v26 = vpop.f32.mrb[10].mxu1 }
 0x1f6   :  { %v1760_v27 = vpop.f32.mrb[11].mxu1 }
 0x1f7   :  { %v891_v28 = vadd.f32 %v1758_v25, %v2486_v0  ;;  %v1761_v29 = vadd.f32 %v1760_v27, %v1759_v26  ;;  %1899 = vmatmul.mubr.bf16.vlgmr.msra.gmra.mrb[64].mxu1 %v1034_v24 }
 0x1f8   :  { %1968 = vmatpush3.bf16.msra.mxu1 %v2080_v5 }
 0x1f9   :  { %v894_v30 = vadd.f32 %v1761_v29, %v2486_v0  ;;  %v1005_v31 = vmax.f32 %v891_v28, 0.0 }
 0x1fb   :  { %v1006_v32 = vmax.f32 %v894_v30, 0.0  ;;  %v1762_v33 = vpop.f32.mrb[12].mxu1 }
 0x1fc   :  { %v1763_v34 = vpop.f32.mrb[13].mxu1 }
 0x1fd   :  { %v1764_v35 = vadd.f32 %v1763_v34, %v1762_v33  ;;  %v1765_v36 = vpop.f32.mrb[14].mxu1  ;;  %v1035_v37 = vpack.c.bf16 %v1006_v32, %v1005_v31 }
 0x1fe   :  { %v1766_v38 = vpop.f32.mrb[15].mxu1 }
 0x1ff   :  { %v899_v39 = vadd.f32 %v1764_v35, %v2486_v0  ;;  %v1767_v40 = vadd.f32 %v1766_v38, %v1765_v36  ;;  %1902 = vmatprep.mubr.bf16.mxu1 %v1035_v37 }
 0x201   :  { %v902_v41 = vadd.f32 %v1767_v40, %v2486_v0  ;;  %v1007_v42 = vmax.f32 %v899_v39, 0.0 }
 0x203   :  { %v1008_v43 = vmax.f32 %v902_v41, 0.0  ;;  %v1768_v44 = vpop.f32.mrb[16].mxu1 }
 0x204   :  { %v1769_v45 = vpop.f32.mrb[17].mxu1 }
 0x205   :  { %v1770_v46 = vadd.f32 %v1769_v45, %v1768_v44  ;;  %v1771_v47 = vpop.f32.mrb[18].mxu1  ;;  %v1036_v48 = vpack.c.bf16 %v1008_v43, %v1007_v42 }
 0x206   :  { %v1772_v49 = vpop.f32.mrb[19].mxu1 }
 0x207   :  { %v907_v50 = vadd.f32 %v1770_v46, %v2486_v0  ;;  %v1773_v51 = vadd.f32 %v1772_v49, %v1771_v47  ;;  %1903 = vmatmul.mubr.bf16.gmra.mrb[68].mxu1 %v1036_v48 }
 0x209   :  { %v910_v52 = vadd.f32 %v1773_v51, %v2486_v0  ;;  %v1009_v53 = vmax.f32 %v907_v50, 0.0 }
 0x20b   :  { %v1010_v54 = vmax.f32 %v910_v52, 0.0  ;;  %v1774_v55 = vpop.f32.mrb[20].mxu1 }
 0x20c   :  { %v1775_v56 = vpop.f32.mrb[21].mxu1 }
 0x20d   :  { %v1776_v57 = vadd.f32 %v1775_v56, %v1774_v55  ;;  %v1777_v58 = vpop.f32.mrb[22].mxu1  ;;  %v1037_v59 = vpack.c.bf16 %v1010_v54, %v1009_v53 }
 0x20e   :  { %v1778_v60 = vpop.f32.mrb[23].mxu1 }
 0x20f   :  { %v915_v61 = vadd.f32 %v1776_v57, %v2486_v0  ;;  %v1779_v62 = vadd.f32 %v1778_v60, %v1777_v58  ;;  %1906 = vmatprep.mubr.bf16.mxu1 %v1037_v59 }
 0x211   :  { %v918_v63 = vadd.f32 %v1779_v62, %v2486_v0  ;;  %v1011_v1 = vmax.f32 %v915_v61, 0.0 }
 0x213   :  { %v1012_v15 = vmax.f32 %v918_v63, 0.0  ;;  %v1780_v2 = vpop.f32.mrb[24].mxu1 }
 0x214   :  { %v1781_v3 = vpop.f32.mrb[25].mxu1 }
 0x215   :  { %v1782_v16 = vadd.f32 %v1781_v3, %v1780_v2  ;;  %v1783_v4 = vpop.f32.mrb[26].mxu1  ;;  %v1038_v5 = vpack.c.bf16 %v1012_v15, %v1011_v1 }
 0x216   :  { %v1784_v6 = vpop.f32.mrb[27].mxu1 }
 0x217   :  { %v923_v7 = vadd.f32 %v1782_v16, %v2486_v0  ;;  %v1785_v8 = vadd.f32 %v1784_v6, %v1783_v4  ;;  %1907 = vmatmul.mubr.bf16.gmra.mrb[72].mxu1 %v1038_v5 }
 0x219   :  { %v926_v9 = vadd.f32 %v1785_v8, %v2486_v0  ;;  %v1013_v10 = vmax.f32 %v923_v7, 0.0 }
 0x21b   :  { %v1014_v11 = vmax.f32 %v926_v9, 0.0  ;;  %v1786_v12 = vpop.f32.mrb[28].mxu1 }
 0x21c   :  { %v1787_v13 = vpop.f32.mrb[29].mxu1 }
 0x21d   :  { %v1788_v14 = vadd.f32 %v1787_v13, %v1786_v12  ;;  %v1789_v17 = vpop.f32.mrb[30].mxu1  ;;  %v1039_v18 = vpack.c.bf16 %v1014_v11, %v1013_v10 }
 0x21e   :  { %v1790_v19 = vpop.f32.mrb[31].mxu1 }
 0x21f   :  { %v931_v20 = vadd.f32 %v1788_v14, %v2486_v0  ;;  %v1791_v21 = vadd.f32 %v1790_v19, %v1789_v17  ;;  %1910 = vmatprep.mubr.bf16.mxu1 %v1039_v18 }
 0x221   :  { %v934_v22 = vadd.f32 %v1791_v21, %v2486_v0  ;;  %v1015_v23 = vmax.f32 %v931_v20, 0.0 }
 0x223   :  { %v1016_v24 = vmax.f32 %v934_v22, 0.0  ;;  %v1792_v25 = vpop.f32.mrb[32].mxu1 }
 0x224   :  { %v1793_v26 = vpop.f32.mrb[33].mxu1 }
 0x225   :  { %v1794_v27 = vadd.f32 %v1793_v26, %v1792_v25  ;;  %v1795_v28 = vpop.f32.mrb[34].mxu1  ;;  %v1040_v29 = vpack.c.bf16 %v1016_v24, %v1015_v23  ;;  %v2081_v25 = vld [vmem:[%s2635_s7 + $0x8] sm:$0xff]  }
 0x226   :  { %v1796_v30 = vpop.f32.mrb[35].mxu1  ;;  %1932 = vmatprep.subr.bf16.mxu0 %v2081_v25  ;;  %1967 = vmatprep.subr.bf16.mxu1 %v2081_v25 }
 0x227   :  { %v939_v31 = vadd.f32 %v1794_v27, %v2486_v0  ;;  %v1797_v32 = vadd.f32 %v1796_v30, %v1795_v28  ;;  %1911 = vmatmul.mubr.bf16.gmra.mrb[76].mxu1 %v1040_v29  ;;  %1933 = vmatpush3.bf16.msra.mxu0 %v2081_v25 }
 0x228   :  { %1969 = vmatpush3.bf16.msra.mxu1 %v2081_v25 }
 0x229   :  { %v942_v33 = vadd.f32 %v1797_v32, %v2486_v0  ;;  %v1017_v34 = vmax.f32 %v939_v31, 0.0 }
 0x22b   :  { %v1018_v35 = vmax.f32 %v942_v33, 0.0  ;;  %v1798_v36 = vpop.f32.mrb[36].mxu1 }
 0x22c   :  { %v1799_v37 = vpop.f32.mrb[37].mxu1 }
 0x22d   :  { %v1800_v38 = vadd.f32 %v1799_v37, %v1798_v36  ;;  %v1801_v39 = vpop.f32.mrb[38].mxu1  ;;  %v1041_v40 = vpack.c.bf16 %v1018_v35, %v1017_v34 }
 0x22e   :  { %v1802_v41 = vpop.f32.mrb[39].mxu1 }
 0x22f   :  { %v947_v42 = vadd.f32 %v1800_v38, %v2486_v0  ;;  %v1803_v43 = vadd.f32 %v1802_v41, %v1801_v39  ;;  %1914 = vmatprep.mubr.bf16.mxu1 %v1041_v40 }
 0x231   :  { %v950_v44 = vadd.f32 %v1803_v43, %v2486_v0  ;;  %v1019_v45 = vmax.f32 %v947_v42, 0.0 }
 0x233   :  { %v1020_v46 = vmax.f32 %v950_v44, 0.0  ;;  %v1804_v47 = vpop.f32.mrb[40].mxu1 }
 0x234   :  { %v1805_v48 = vpop.f32.mrb[41].mxu1 }
 0x235   :  { %v1806_v49 = vadd.f32 %v1805_v48, %v1804_v47  ;;  %v1807_v50 = vpop.f32.mrb[42].mxu1  ;;  %v1042_v51 = vpack.c.bf16 %v1020_v46, %v1019_v45 }
 0x236   :  { %v1808_v52 = vpop.f32.mrb[43].mxu1 }
 0x237   :  { %v955_v53 = vadd.f32 %v1806_v49, %v2486_v0  ;;  %v1809_v54 = vadd.f32 %v1808_v52, %v1807_v50  ;;  %1915 = vmatmul.mubr.bf16.gmra.mrb[80].mxu1 %v1042_v51  ;;  %v2529_v52 = vld [vmem:[%s2634_s6] ss:$0 sm:$0xff] }
 0x239   :  { %v958_v55 = vadd.f32 %v1809_v54, %v2486_v0  ;;  %v1021_v56 = vmax.f32 %v955_v53, 0.0 }
 0x23b   :  { %v1022_v57 = vmax.f32 %v958_v55, 0.0  ;;  %v1810_v58 = vpop.f32.mrb[44].mxu1 }
 0x23c   :  { %v1811_v59 = vpop.f32.mrb[45].mxu1 }
 0x23d   :  { %v1812_v60 = vadd.f32 %v1811_v59, %v1810_v58  ;;  %v1813_v61 = vpop.f32.mrb[46].mxu1  ;;  %v1043_v62 = vpack.c.bf16 %v1022_v57, %v1021_v56 }
 0x23e   :  { %v1814_v63 = vpop.f32.mrb[47].mxu1 }
 0x23f   :  { %v963_v1 = vadd.f32 %v1812_v60, %v2486_v0  ;;  %v1815_v15 = vadd.f32 %v1814_v63, %v1813_v61  ;;  %1918 = vmatprep.mubr.bf16.mxu1 %v1043_v62 }
 0x241   :  { %v966_v2 = vadd.f32 %v1815_v15, %v2486_v0  ;;  %v1023_v3 = vmax.f32 %v963_v1, 0.0 }
 0x243   :  { %v1024_v16 = vmax.f32 %v966_v2, 0.0  ;;  %v1816_v4 = vpop.f32.mrb[48].mxu1 }
 0x244   :  { %v1817_v5 = vpop.f32.mrb[49].mxu1 }
 0x245   :  { %v1818_v6 = vadd.f32 %v1817_v5, %v1816_v4  ;;  %v1819_v7 = vpop.f32.mrb[50].mxu1  ;;  %v1044_v8 = vpack.c.bf16 %v1024_v16, %v1023_v3 }
 0x246   :  { %v1820_v9 = vpop.f32.mrb[51].mxu1 }
 0x247   :  { %v971_v10 = vadd.f32 %v1818_v6, %v2486_v0  ;;  %v1821_v11 = vadd.f32 %v1820_v9, %v1819_v7  ;;  %1919 = vmatmul.mubr.bf16.gmra.mrb[84].mxu1 %v1044_v8 }
 0x249   :  { %v974_v12 = vadd.f32 %v1821_v11, %v2486_v0  ;;  %v1025_v13 = vmax.f32 %v971_v10, 0.0 }
 0x24b   :  { %v1026_v14 = vmax.f32 %v974_v12, 0.0  ;;  %v1822_v17 = vpop.f32.mrb[52].mxu1 }
 0x24c   :  { %v1823_v18 = vpop.f32.mrb[53].mxu1 }
 0x24d   :  { %v1824_v19 = vadd.f32 %v1823_v18, %v1822_v17  ;;  %v1825_v20 = vpop.f32.mrb[54].mxu1  ;;  %v1045_v21 = vpack.c.bf16 %v1026_v14, %v1025_v13 }
 0x24e   :  { %v1826_v22 = vpop.f32.mrb[55].mxu1 }
 0x24f   :  { %v979_v23 = vadd.f32 %v1824_v19, %v2486_v0  ;;  %v1827_v24 = vadd.f32 %v1826_v22, %v1825_v20  ;;  %1922 = vmatprep.mubr.bf16.mxu1 %v1045_v21 }
 0x251   :  { %v982_v26 = vadd.f32 %v1827_v24, %v2486_v0  ;;  %v1027_v27 = vmax.f32 %v979_v23, 0.0 }
 0x253   :  { %v1028_v28 = vmax.f32 %v982_v26, 0.0  ;;  %v1828_v29 = vpop.f32.mrb[56].mxu1 }
 0x254   :  { %v1829_v30 = vpop.f32.mrb[57].mxu1 }
 0x255   :  { %v1830_v31 = vadd.f32 %v1829_v30, %v1828_v29  ;;  %v1831_v32 = vpop.f32.mrb[58].mxu1  ;;  %v1046_v33 = vpack.c.bf16 %v1028_v28, %v1027_v27 }
 0x256   :  { %v1832_v34 = vpop.f32.mrb[59].mxu1 }
 0x257   :  { %v987_v35 = vadd.f32 %v1830_v31, %v2486_v0  ;;  %v1833_v36 = vadd.f32 %v1832_v34, %v1831_v32  ;;  %1923 = vmatmul.mubr.bf16.gmra.mrb[88].mxu1 %v1046_v33 }
 0x259   :  { %v990_v37 = vadd.f32 %v1833_v36, %v2486_v0  ;;  %v1029_v38 = vmax.f32 %v987_v35, 0.0 }
 0x25b   :  { %v1030_v39 = vmax.f32 %v990_v37, 0.0  ;;  %v1834_v40 = vpop.f32.mrb[60].mxu1 }
 0x25c   :  { %v1835_v41 = vpop.f32.mrb[61].mxu1 }
 0x25d   :  { %v1836_v42 = vadd.f32 %v1835_v41, %v1834_v40  ;;  %v1837_v43 = vpop.f32.mrb[62].mxu1  ;;  %v1047_v44 = vpack.c.bf16 %v1030_v39, %v1029_v38 }
 0x25e   :  { %v1838_v45 = vpop.f32.mrb[63].mxu1 }
 0x25f   :  { %v995_v46 = vadd.f32 %v1836_v42, %v2486_v0  ;;  %v1839_v47 = vadd.f32 %v1838_v45, %v1837_v43  ;;  %1926 = vmatprep.mubr.bf16.mxu1 %v1047_v44 }
 0x261   :  { %v998_v48 = vadd.f32 %v1839_v47, %v2486_v0  ;;  %v1031_v49 = vmax.f32 %v995_v46, 0.0 }
 0x263   :  { %v1032_v50 = vmax.f32 %v998_v48, 0.0 }
 0x265   :  { %v1048_v51 = vpack.c.bf16 %v1032_v50, %v1031_v49 }
 0x267   :  { %1927 = vmatmul.mubr.bf16.gmra.mrb[92].mxu1 %v1048_v51 }
 0x2ca   :  { %v1900_v53 = vpop.f32.mrb[64].mxu1 }
 0x2cb   :  { %v1163_v54 = vadd.f32 %v1900_v53, %v2529_v52  ;;  %v1154_v55 = vpop.f32.mrb[65].mxu1 }
 0x2cc   :  { %v1155_v56 = vadd.f32 %v2529_v52, %v1154_v55  ;;  %v1901_v57 = vpop.f32.mrb[66].mxu1 }
 0x2cd   :  { %v1166_v58 = vadd.f32 %v1901_v57, %v2529_v52  ;;  %v1157_v59 = vpop.f32.mrb[67].mxu1  ;;  %v1283_v60 = vmax.f32 %v1163_v54, 0.0 }
 0x2ce   :  { %v1158_v0 = vadd.f32 %v2529_v52, %v1157_v59  ;;  %v1281_v62 = vmax.f32 %v1155_v56, 0.0 }
 0x2cf   :  { %v1284_v61 = vmax.f32 %v1166_v58, 0.0 }
 0x2d0   :  { %v1282_v63 = vmax.f32 %v1158_v0, 0.0 }
 0x2d1   :  { %v1314_v1 = vpack.c.bf16 %v1284_v61, %v1283_v60 }
 0x2d2   :  { %v1313_v15 = vpack.c.bf16 %v1282_v63, %v1281_v62 }
 0x2d4   :  { %1934 = vmatprep.mubr.msk.bf16.mxu0 %vm1352_vm2, %v1313_v15 }
 0x2d5   :  { %1935 = vmatmul.mubr.msk.bf16.vlgmr.msra.gmra.mrb[64].mxu0 %vm1352_vm2, %v1314_v1 }
 0x2da   :  { %v1904_v2 = vpop.f32.mrb[68].mxu1 }
 0x2db   :  { %v1179_v3 = vadd.f32 %v1904_v2, %v2529_v52  ;;  %v1170_v16 = vpop.f32.mrb[69].mxu1 }
 0x2dc   :  { %v1171_v4 = vadd.f32 %v2529_v52, %v1170_v16  ;;  %v1905_v5 = vpop.f32.mrb[70].mxu1 }
 0x2dd   :  { %v1182_v6 = vadd.f32 %v1905_v5, %v2529_v52  ;;  %v1173_v7 = vpop.f32.mrb[71].mxu1  ;;  %v1287_v9 = vmax.f32 %v1179_v3, 0.0 }
 0x2de   :  { %v1174_v8 = vadd.f32 %v2529_v52, %v1173_v7  ;;  %v1285_v11 = vmax.f32 %v1171_v4, 0.0 }
 0x2df   :  { %v1288_v10 = vmax.f32 %v1182_v6, 0.0 }
 0x2e0   :  { %v1286_v12 = vmax.f32 %v1174_v8, 0.0 }
 0x2e1   :  { %v1316_v13 = vpack.c.bf16 %v1288_v10, %v1287_v9 }
 0x2e2   :  { %v1315_v14 = vpack.c.bf16 %v1286_v12, %v1285_v11 }
 0x2e4   :  { %1938 = vmatprep.mubr.msk.bf16.mxu0 %vm1352_vm2, %v1315_v14 }
 0x2e5   :  { %1939 = vmatmul.mubr.msk.bf16.gmra.mrb[68].mxu0 %vm1352_vm2, %v1316_v13 }
 0x2ea   :  { %v1908_v17 = vpop.f32.mrb[72].mxu1 }
 0x2eb   :  { %v1195_v18 = vadd.f32 %v1908_v17, %v2529_v52  ;;  %v1186_v19 = vpop.f32.mrb[73].mxu1 }
 0x2ec   :  { %v1187_v20 = vadd.f32 %v2529_v52, %v1186_v19  ;;  %v1909_v21 = vpop.f32.mrb[74].mxu1 }
 0x2ed   :  { %v1198_v22 = vadd.f32 %v1909_v21, %v2529_v52  ;;  %v1189_v23 = vpop.f32.mrb[75].mxu1  ;;  %v1291_v25 = vmax.f32 %v1195_v18, 0.0 }
 0x2ee   :  { %v1190_v24 = vadd.f32 %v2529_v52, %v1189_v23  ;;  %v1289_v27 = vmax.f32 %v1187_v20, 0.0 }
 0x2ef   :  { %v1292_v26 = vmax.f32 %v1198_v22, 0.0 }
 0x2f0   :  { %v1290_v28 = vmax.f32 %v1190_v24, 0.0 }
 0x2f1   :  { %v1318_v29 = vpack.c.bf16 %v1292_v26, %v1291_v25 }
 0x2f2   :  { %v1317_v30 = vpack.c.bf16 %v1290_v28, %v1289_v27 }
 0x2f4   :  { %1942 = vmatprep.mubr.msk.bf16.mxu0 %vm1352_vm2, %v1317_v30 }
 0x2f5   :  { %1943 = vmatmul.mubr.msk.bf16.gmra.mrb[72].mxu0 %vm1352_vm2, %v1318_v29 }
 0x2fa   :  { %v1912_v31 = vpop.f32.mrb[76].mxu1 }
 0x2fb   :  { %v1211_v32 = vadd.f32 %v1912_v31, %v2529_v52  ;;  %v1202_v33 = vpop.f32.mrb[77].mxu1 }
 0x2fc   :  { %v1203_v34 = vadd.f32 %v2529_v52, %v1202_v33  ;;  %v1913_v35 = vpop.f32.mrb[78].mxu1 }
 0x2fd   :  { %v1214_v36 = vadd.f32 %v1913_v35, %v2529_v52  ;;  %v1205_v37 = vpop.f32.mrb[79].mxu1  ;;  %v1295_v39 = vmax.f32 %v1211_v32, 0.0 }
 0x2fe   :  { %v1206_v38 = vadd.f32 %v2529_v52, %v1205_v37  ;;  %v1293_v41 = vmax.f32 %v1203_v34, 0.0 }
 0x2ff   :  { %v1296_v40 = vmax.f32 %v1214_v36, 0.0 }
 0x300   :  { %v1294_v42 = vmax.f32 %v1206_v38, 0.0  ;;  %v2582_v38 = vld [vmem:[%s2636_s8] ss:$0 sm:$0xff]  ;;  %s2106_s8 = smov [#allocation2]  }
 0x301   :  { %v1320_v43 = vpack.c.bf16 %v1296_v40, %v1295_v39  ;;  %s1599_s19 = sshll.u32 %s2106_s8, 4  ;;  %s1600_s19 = int_to_ptr.vmem [resolvable:$true] %s1599_s19 }
 0x302   :  { %v1319_v44 = vpack.c.bf16 %v1294_v42, %v1293_v41  ;;  %s2082_s20 = scalar_lea.vmem %s1600_s19, 4096  ;;  %p2087_p1 = scmp.lt.s32.totalorder %s1600_s19, %s1600_s19 }
 0x303   :  { %p2083_p0 = scmp.ne.s32.totalorder %s1600_s19, %s2082_s20  ;;  %p2088_p2 = scmp.lt.s32.totalorder %s2082_s20, %s2082_s20 }
 0x304   :  { %1946 = vmatprep.mubr.msk.bf16.mxu0 %vm1352_vm2, %v1319_v44 }
 0x305   :  { %1947 = vmatmul.mubr.msk.bf16.gmra.mrb[76].mxu0 %vm1352_vm2, %v1320_v43  ;;  %p2089_p3 = por %p2088_p2, %p2087_p1 }
 0x307   :  { %p2090_p4 = pnand %p2089_p3, %p2083_p0 }
 0x30a   :  { %v1916_v45 = vpop.f32.mrb[80].mxu1 }
 0x30b   :  { %v1227_v46 = vadd.f32 %v1916_v45, %v2529_v52  ;;  %v1218_v47 = vpop.f32.mrb[81].mxu1 }
 0x30c   :  { %v1219_v48 = vadd.f32 %v2529_v52, %v1218_v47  ;;  %v1917_v49 = vpop.f32.mrb[82].mxu1 }
 0x30d   :  { %v1230_v50 = vadd.f32 %v1917_v49, %v2529_v52  ;;  %v1221_v51 = vpop.f32.mrb[83].mxu1  ;;  %v1299_v54 = vmax.f32 %v1227_v46, 0.0 }
 0x30e   :  { %v1222_v53 = vadd.f32 %v2529_v52, %v1221_v51  ;;  %v1297_v56 = vmax.f32 %v1219_v48, 0.0 }
 0x30f   :  { %v1300_v55 = vmax.f32 %v1230_v50, 0.0 }
 0x310   :  { %v1298_v57 = vmax.f32 %v1222_v53, 0.0 }
 0x311   :  { %v1322_v58 = vpack.c.bf16 %v1300_v55, %v1299_v54 }
 0x312   :  { %v1321_v59 = vpack.c.bf16 %v1298_v57, %v1297_v56 }
 0x314   :  { %1950 = vmatprep.mubr.msk.bf16.mxu0 %vm1352_vm2, %v1321_v59 }
 0x315   :  { %1951 = vmatmul.mubr.msk.bf16.gmra.mrb[80].mxu0 %vm1352_vm2, %v1322_v58 }
 0x31a   :  { %v1920_v0 = vpop.f32.mrb[84].mxu1 }
 0x31b   :  { %v1243_v60 = vadd.f32 %v1920_v0, %v2529_v52  ;;  %v1234_v61 = vpop.f32.mrb[85].mxu1 }
 0x31c   :  { %v1235_v62 = vadd.f32 %v2529_v52, %v1234_v61  ;;  %v1921_v63 = vpop.f32.mrb[86].mxu1 }
 0x31d   :  { %v1246_v1 = vadd.f32 %v1921_v63, %v2529_v52  ;;  %v1237_v15 = vpop.f32.mrb[87].mxu1  ;;  %v1303_v3 = vmax.f32 %v1243_v60, 0.0 }
 0x31e   :  { %v1238_v2 = vadd.f32 %v2529_v52, %v1237_v15  ;;  %v1301_v4 = vmax.f32 %v1235_v62, 0.0 }
 0x31f   :  { %v1304_v16 = vmax.f32 %v1246_v1, 0.0 }
 0x320   :  { %v1302_v5 = vmax.f32 %v1238_v2, 0.0 }
 0x321   :  { %v1324_v6 = vpack.c.bf16 %v1304_v16, %v1303_v3 }
 0x322   :  { %v1323_v7 = vpack.c.bf16 %v1302_v5, %v1301_v4 }
 0x324   :  { %1954 = vmatprep.mubr.msk.bf16.mxu0 %vm1352_vm2, %v1323_v7 }
 0x325   :  { %1955 = vmatmul.mubr.msk.bf16.gmra.mrb[84].mxu0 %vm1352_vm2, %v1324_v6 }
 0x32a   :  { %v1924_v8 = vpop.f32.mrb[88].mxu1 }
 0x32b   :  { %v1259_v9 = vadd.f32 %v1924_v8, %v2529_v52  ;;  %v1250_v10 = vpop.f32.mrb[89].mxu1 }
 0x32c   :  { %v1251_v11 = vadd.f32 %v2529_v52, %v1250_v10  ;;  %v1925_v12 = vpop.f32.mrb[90].mxu1 }
 0x32d   :  { %v1262_v13 = vadd.f32 %v1925_v12, %v2529_v52  ;;  %v1253_v14 = vpop.f32.mrb[91].mxu1  ;;  %v1307_v18 = vmax.f32 %v1259_v9, 0.0 }
 0x32e   :  { %v1254_v17 = vadd.f32 %v2529_v52, %v1253_v14  ;;  %v1305_v20 = vmax.f32 %v1251_v11, 0.0 }
 0x32f   :  { %v1308_v19 = vmax.f32 %v1262_v13, 0.0 }
 0x330   :  { %v1306_v21 = vmax.f32 %v1254_v17, 0.0 }
 0x331   :  { %v1326_v22 = vpack.c.bf16 %v1308_v19, %v1307_v18 }
 0x332   :  { %v1325_v23 = vpack.c.bf16 %v1306_v21, %v1305_v20 }
 0x334   :  { %1958 = vmatprep.mubr.msk.bf16.mxu0 %vm1352_vm2, %v1325_v23 }
 0x335   :  { %1959 = vmatmul.mubr.msk.bf16.gmra.mrb[88].mxu0 %vm1352_vm2, %v1326_v22 }
 0x33a   :  { %v1928_v24 = vpop.f32.mrb[92].mxu1 }
 0x33b   :  { %v1275_v25 = vadd.f32 %v1928_v24, %v2529_v52  ;;  %v1266_v26 = vpop.f32.mrb[93].mxu1 }
 0x33c   :  { %v1267_v27 = vadd.f32 %v2529_v52, %v1266_v26  ;;  %v1929_v28 = vpop.f32.mrb[94].mxu1 }
 0x33d   :  { %v1278_v29 = vadd.f32 %v1929_v28, %v2529_v52  ;;  %v1269_v30 = vpop.f32.mrb[95].mxu1  ;;  %v1311_v32 = vmax.f32 %v1275_v25, 0.0 }
 0x33e   :  { %v1270_v31 = vadd.f32 %v2529_v52, %v1269_v30  ;;  %v1309_v34 = vmax.f32 %v1267_v27, 0.0 }
 0x33f   :  { %v1312_v33 = vmax.f32 %v1278_v29, 0.0 }
 0x340   :  { %v1310_v35 = vmax.f32 %v1270_v31, 0.0 }
 0x341   :  { %v1328_v36 = vpack.c.bf16 %v1312_v33, %v1311_v32 }
 0x342   :  { %v1327_v37 = vpack.c.bf16 %v1310_v35, %v1309_v34 }
 0x344   :  { %1962 = vmatprep.mubr.msk.bf16.mxu1 %vm1352_vm2, %v1327_v37 }
 0x345   :  { %1963 = vmatmul.mubr.msk.bf16.vlgmr.msra.gmra.mrb[96].mxu1 %vm1352_vm2, %v1328_v36 }
 0x3a8   :  { %v1936_v39 = vpop.f32.mrb[64].mxu0 }
 0x3a9   :  { %v1444_v40 = vadd.f32 %v1936_v39, %v2582_v38  ;;  %v1435_v41 = vpop.f32.mrb[65].mxu0 }
 0x3aa   :  { %v1436_v52 = vadd.f32 %v2582_v38, %v1435_v41  ;;  %v1937_v42 = vpop.f32.mrb[66].mxu0 }
 0x3ab   :  { %1564 = vst [vmem:[#allocation2 + $0x10] sm:$0xff] %v1444_v40  ;;  %v1447_v43 = vadd.f32 %v1937_v42, %v2582_v38  ;;  %v1438_v44 = vpop.f32.mrb[67].mxu0 }
 0x3ac   :  { %1562 = vst [vmem:[#allocation2] sm:$0xff] %v1436_v52  ;;  %v1439_v45 = vadd.f32 %v2582_v38, %v1438_v44 }
 0x3ad   :  { %1565 = vst [vmem:[#allocation2 + $0x18] sm:$0xff] %v1447_v43 }
 0x3ae   :  { %1563 = vst [vmem:[#allocation2 + $0x8] sm:$0xff] %v1439_v45 }
 0x3b8   :  { %v1940_v46 = vpop.f32.mrb[68].mxu0 }
 0x3b9   :  { %v1460_v47 = vadd.f32 %v1940_v46, %v2582_v38  ;;  %v1451_v48 = vpop.f32.mrb[69].mxu0 }
 0x3ba   :  { %v1452_v49 = vadd.f32 %v2582_v38, %v1451_v48  ;;  %v1941_v50 = vpop.f32.mrb[70].mxu0 }
 0x3bb   :  { %1568 = vst [vmem:[#allocation2 + $0x30] sm:$0xff] %v1460_v47  ;;  %v1463_v51 = vadd.f32 %v1941_v50, %v2582_v38  ;;  %v1454_v53 = vpop.f32.mrb[71].mxu0 }
 0x3bc   :  { %1566 = vst [vmem:[#allocation2 + $0x20] sm:$0xff] %v1452_v49  ;;  %v1455_v54 = vadd.f32 %v2582_v38, %v1454_v53 }
 0x3bd   :  { %1569 = vst [vmem:[#allocation2 + $0x38] sm:$0xff] %v1463_v51 }
 0x3be   :  { %1567 = vst [vmem:[#allocation2 + $0x28] sm:$0xff] %v1455_v54 }
 0x3c8   :  { %v1944_v55 = vpop.f32.mrb[72].mxu0 }
 0x3c9   :  { %v1476_v56 = vadd.f32 %v1944_v55, %v2582_v38  ;;  %v1467_v57 = vpop.f32.mrb[73].mxu0 }
 0x3ca   :  { %v1468_v58 = vadd.f32 %v2582_v38, %v1467_v57  ;;  %v1945_v59 = vpop.f32.mrb[74].mxu0 }
 0x3cb   :  { %1572 = vst [vmem:[#allocation2 + $0x50] sm:$0xff] %v1476_v56  ;;  %v1479_v0 = vadd.f32 %v1945_v59, %v2582_v38  ;;  %v1470_v60 = vpop.f32.mrb[75].mxu0 }
 0x3cc   :  { %1570 = vst [vmem:[#allocation2 + $0x40] sm:$0xff] %v1468_v58  ;;  %v1471_v61 = vadd.f32 %v2582_v38, %v1470_v60 }
 0x3cd   :  { %1573 = vst [vmem:[#allocation2 + $0x58] sm:$0xff] %v1479_v0 }
 0x3ce   :  { %1571 = vst [vmem:[#allocation2 + $0x48] sm:$0xff] %v1471_v61 }
 0x3d8   :  { %v1948_v62 = vpop.f32.mrb[76].mxu0 }
 0x3d9   :  { %v1492_v63 = vadd.f32 %v1948_v62, %v2582_v38  ;;  %v1483_v1 = vpop.f32.mrb[77].mxu0 }
 0x3da   :  { %v1484_v15 = vadd.f32 %v2582_v38, %v1483_v1  ;;  %v1949_v2 = vpop.f32.mrb[78].mxu0 }
 0x3db   :  { %1576 = vst [vmem:[#allocation2 + $0x70] sm:$0xff] %v1492_v63  ;;  %v1495_v3 = vadd.f32 %v1949_v2, %v2582_v38  ;;  %v1486_v16 = vpop.f32.mrb[79].mxu0 }
 0x3dc   :  { %1574 = vst [vmem:[#allocation2 + $0x60] sm:$0xff] %v1484_v15  ;;  %v1487_v4 = vadd.f32 %v2582_v38, %v1486_v16 }
 0x3dd   :  { %1577 = vst [vmem:[#allocation2 + $0x78] sm:$0xff] %v1495_v3 }
 0x3de   :  { %1575 = vst [vmem:[#allocation2 + $0x68] sm:$0xff] %v1487_v4 }
 0x3e8   :  { %v1952_v5 = vpop.f32.mrb[80].mxu0 }
 0x3e9   :  { %v1508_v6 = vadd.f32 %v1952_v5, %v2582_v38  ;;  %v1499_v7 = vpop.f32.mrb[81].mxu0 }
 0x3ea   :  { %v1500_v8 = vadd.f32 %v2582_v38, %v1499_v7  ;;  %v1953_v9 = vpop.f32.mrb[82].mxu0 }
 0x3eb   :  { %1580 = vst [vmem:[#allocation2 + $0x90] sm:$0xff] %v1508_v6  ;;  %v1511_v10 = vadd.f32 %v1953_v9, %v2582_v38  ;;  %v1502_v11 = vpop.f32.mrb[83].mxu0 }
 0x3ec   :  { %1578 = vst [vmem:[#allocation2 + $0x80] sm:$0xff] %v1500_v8  ;;  %v1503_v12 = vadd.f32 %v2582_v38, %v1502_v11 }
 0x3ed   :  { %1581 = vst [vmem:[#allocation2 + $0x98] sm:$0xff] %v1511_v10 }
 0x3ee   :  { %1579 = vst [vmem:[#allocation2 + $0x88] sm:$0xff] %v1503_v12 }
 0x3f8   :  { %v1956_v13 = vpop.f32.mrb[84].mxu0 }
 0x3f9   :  { %v1524_v14 = vadd.f32 %v1956_v13, %v2582_v38  ;;  %v1515_v17 = vpop.f32.mrb[85].mxu0 }
 0x3fa   :  { %v1516_v18 = vadd.f32 %v2582_v38, %v1515_v17  ;;  %v1957_v19 = vpop.f32.mrb[86].mxu0 }
 0x3fb   :  { %1584 = vst [vmem:[#allocation2 + $0xb0] sm:$0xff] %v1524_v14  ;;  %v1527_v20 = vadd.f32 %v1957_v19, %v2582_v38  ;;  %v1518_v21 = vpop.f32.mrb[87].mxu0 }
 0x3fc   :  { %1582 = vst [vmem:[#allocation2 + $0xa0] sm:$0xff] %v1516_v18  ;;  %v1519_v22 = vadd.f32 %v2582_v38, %v1518_v21 }
 0x3fd   :  { %1585 = vst [vmem:[#allocation2 + $0xb8] sm:$0xff] %v1527_v20 }
 0x3fe   :  { %1583 = vst [vmem:[#allocation2 + $0xa8] sm:$0xff] %v1519_v22 }
 0x408   :  { %v1960_v23 = vpop.f32.mrb[88].mxu0 }
 0x409   :  { %v1540_v24 = vadd.f32 %v1960_v23, %v2582_v38  ;;  %v1531_v25 = vpop.f32.mrb[89].mxu0 }
 0x40a   :  { %v1532_v26 = vadd.f32 %v2582_v38, %v1531_v25  ;;  %v1961_v27 = vpop.f32.mrb[90].mxu0 }
 0x40b   :  { %1588 = vst [vmem:[#allocation2 + $0xd0] sm:$0xff] %v1540_v24  ;;  %v1543_v28 = vadd.f32 %v1961_v27, %v2582_v38  ;;  %v1534_v29 = vpop.f32.mrb[91].mxu0 }
 0x40c   :  { %1586 = vst [vmem:[#allocation2 + $0xc0] sm:$0xff] %v1532_v26  ;;  %v1535_v30 = vadd.f32 %v2582_v38, %v1534_v29 }
 0x40d   :  { %1589 = vst [vmem:[#allocation2 + $0xd8] sm:$0xff] %v1543_v28 }
 0x40e   :  { %1587 = vst [vmem:[#allocation2 + $0xc8] sm:$0xff] %v1535_v30 }
 0x418   :  { %v1964_v31 = vpop.f32.mrb[96].mxu1 }
 0x419   :  { %v1556_v32 = vadd.f32 %v1964_v31, %v2582_v38  ;;  %v1547_v33 = vpop.f32.mrb[97].mxu1 }
 0x41a   :  { %v1548_v34 = vadd.f32 %v2582_v38, %v1547_v33  ;;  %v1965_v35 = vpop.f32.mrb[98].mxu1 }
 0x41b   :  { %1592 = vst [vmem:[#allocation2 + $0xf0] sm:$0xff] %v1556_v32  ;;  %v1559_v36 = vadd.f32 %v1965_v35, %v2582_v38  ;;  %v1550_v37 = vpop.f32.mrb[99].mxu1 }
 0x41c   :  { %1590 = vst [vmem:[#allocation2 + $0xe0] sm:$0xff] %v1548_v34  ;;  %v1551_v39 = vadd.f32 %v2582_v38, %v1550_v37 }
 0x41d   :  { %1593 = vst [vmem:[#allocation2 + $0xf8] sm:$0xff] %v1559_v36 }
 0x41e   :  { %1591 = vst [vmem:[#allocation2 + $0xe8] sm:$0xff] %v1551_v39 }
 0x41f   :  { %2093 = shalt.err (!%p2090_p4)
}
 0x420   :  { %s2094_s21 = scalar_lea.hbm %s2637_s9, 4096 }
 0x421   :  { %p2095_p5 = scmp.ne.s32.totalorder %s2637_s9, %s2094_s21  ;;  %p2098_p6 = scmp.lt.u32.totalorder %s2094_s21, %s2637_s9 }
 0x423   :  { %p2100_p7 = pnand %p2098_p6, %p2095_p5 }
 0x425   :  { %2103 = shalt.err (!%p2100_p7)
}
 0x426   :  { %s2107_s25 = smov 128   ;;  %s2108_s26 = smov 8  }
 0x427   :  { %1605 = dma.vmem_to_hbm [thread:$0]  %s1600_s19, 4096, %s2637_s9, [#allocation3], %s2107_s25, %s2107_s25, %s2108_s26  }
 0x428   :  { %2104 = dma.done.wait [#allocation3], 4096  }
 0x429   :  { %2105 = vsyncadd [#allocation3], 4294963200 }
 0x42a   :  { %1609 = vsyncpa [#allocation3], 1 }

</bundles_post_ra>
